<compile_context>
chip_gen: v7x
topology: tpu7x:2x2x1
jax: 0.10.0
libtpu: 0.0.40
codegen_flags: <defaults>
</compile_context>

<pallas_src>
import jax
import jax.numpy as jnp
from jax.experimental import pallas as pl
from jax.experimental.pallas import tpu as pltpu

# ---------------- module hyper-parameters (from __init__) ----------------
LONGEST_WINDOW = 600
EMBED_SIZE = 16
HEADS = 2
HEAD_DIM = (2 * EMBED_SIZE) // HEADS          # keys / queries head dim  = 16
VEMBED = EMBED_SIZE // 2                      # output embed size        = 8
VHEAD_DIM = VEMBED // HEADS                   # values head dim          = 4
assert HEAD_DIM * HEADS == 2 * EMBED_SIZE

# small demo sizes
N, LQ, LK, LV, WIN = 2, 8, 10, 10, 6          # batch, query_len, key_len, value_len, window

_HIGH = jax.lax.Precision.HIGHEST             # exact f32 matmuls everywhere


# =====================  fused attention + fc_out kernel  =====================
def attn_fc_kernel(q_ref, k_ref, v_ref, m_ref,
                   wqbd_ref, wkbd_ref, wvbd_ref, wfc_ref, bfc_ref,
                   out_ref, attn_ref):
    # one batch element per grid step; all heads + fc_out fused in this body
    q = q_ref[...]           # (LQ, H*hd)   lane-dense
    k = k_ref[...]           # (LK, H*hd)
    v = v_ref[...]           # (LV, H*vhd)
    m = m_ref[...]           # (LQ, W) int32 window indices in [0, LK]

    lq, w = m.shape
    lk = k.shape[0]

    # batched bias-free projections: one MXU dot per weight (block-diagonal
    # per-head weight applies the shared Linear to every head at once)
    qp = jnp.dot(q, wqbd_ref[...], precision=_HIGH,
                 preferred_element_type=jnp.float32)                     # (LQ, H*hd)
    kp = jnp.dot(k, wkbd_ref[...], precision=_HIGH,
                 preferred_element_type=jnp.float32)                     # (LK, H*hd)
    vp = jnp.dot(v, wvbd_ref[...], precision=_HIGH,
                 preferred_element_type=jnp.float32)                     # (LV, H*vhd)

    # torch.gather as MXU matmuls: float one-hot over key indices [0, LK).
    # An index m == LK (the reference's appended zero row) matches nothing and
    # therefore gathers an exactly-zero row — identical to the reference.
    oh = (jax.lax.broadcasted_iota(jnp.int32, (lq, w, lk), 2)
          == m[:, :, None]).astype(jnp.float32)                          # (LQ, W, LK)
    kp_b = jnp.broadcast_to(kp[None, :, :], (lq,) + kp.shape)            # (LQ, LK, H*hd)
    vp_b = jnp.broadcast_to(vp[None, :, :], (lq,) + vp.shape)            # (LQ, LV, H*vhd)
    # one batched MXU dot gathers K for ALL heads, one gathers V for ALL heads
    kg = jnp.einsum('lwk,lkc->lwc', oh, kp_b, precision=_HIGH,
                    preferred_element_type=jnp.float32)                  # (LQ, W, H*hd)
    vg = jnp.einsum('lwk,lkc->lwc', oh, vp_b, precision=_HIGH,
                    preferred_element_type=jnp.float32)                  # (LQ, W, H*vhd)

    masked = (m == LONGEST_WINDOW)                                       # (LQ, W)

    acc = None
    attn = None
    for i in range(HEADS):                     # HEADS=2, unrolled at trace time
        qp_i = qp[:, i * HEAD_DIM:(i + 1) * HEAD_DIM]                    # (LQ, hd)
        kg_i = kg[:, :, i * HEAD_DIM:(i + 1) * HEAD_DIM]                 # (LQ, W, hd)
        vg_i = vg[:, :, i * VHEAD_DIM:(i + 1) * VHEAD_DIM]               # (LQ, W, vhd)

        # energy from the gathered keys (tiny per-head contraction over hd)
        e = jnp.sum(kg_i * qp_i[:, None, :], axis=-1)                    # (LQ, W)

        # energy.masked_fill(mask == longest_window, -1e20) + softmax over window
        e = jnp.where(masked, -1e20, e)
        e_max = jnp.max(e, axis=-1, keepdims=True)
        p = jnp.exp(e - e_max)
        attn = p / jnp.sum(p, axis=-1, keepdims=True)                    # exact division

        # weighted sum of gathered values
        head_out = jnp.sum(attn[:, :, None] * vg_i, axis=1)              # (LQ, vhd)

        # fused fc_out: per-head accumulation against a static weight slice
        # (replaces the lane-concat of heads + single big dot)
        contrib = jnp.dot(head_out,
                          wfc_ref[i * VHEAD_DIM:(i + 1) * VHEAD_DIM, :],
                          precision=_HIGH,
                          preferred_element_type=jnp.float32)            # (LQ, VEMBED)
        acc = contrib if acc is None else acc + contrib

    out_ref[...] = acc + bfc_ref[...]                                    # (LQ, VEMBED)
    attn_ref[...] = attn                                                 # last head (LQ, W)


# =====================  wrapper  =====================
def self_attention_forward(value, key, query, mask_ori, params):
    """value: (N, Lv, H, vhd)  key: (N, Lk, H, hd)  query: (N, L, H, hd)
       mask_ori: (N, L, W) int window indices (index Lk == zero-pad row)."""
    n, lq = query.shape[0], query.shape[1]
    lk, lv = key.shape[1], value.shape[1]
    h, hd, vhd, w = HEADS, HEAD_DIM, VHEAD_DIM, mask_ori.shape[-1]

    # contiguous (free) reshapes only -- no transposes, no zero-row padding
    q2 = query.reshape(n, lq, h * hd)
    k2 = key.reshape(n, lk, h * hd)
    v2 = value.reshape(n, lv, h * vhd)
    mask = mask_ori.astype(jnp.int32)

    # block-diagonal per-head projection weights (single dot per weight in-kernel)
    eye_h = jnp.eye(h, dtype=jnp.float32)
    wq_bd = jnp.kron(eye_h, params["wq_t"])            # (h*hd, h*hd)
    wk_bd = jnp.kron(eye_h, params["wk_t"])            # (h*hd, h*hd)
    wv_bd = jnp.kron(eye_h, params["wv_t"])            # (h*vhd, h*vhd)

    out, attn = pl.pallas_call(
        attn_fc_kernel,
        out_shape=(jax.ShapeDtypeStruct((n, lq, VEMBED), jnp.float32),
                   jax.ShapeDtypeStruct((n, lq, w), jnp.float32)),
        grid_spec=pltpu.PrefetchScalarGridSpec(
            num_scalar_prefetch=0,
            grid=(n,),
            in_specs=[
                # leading size-1 batch dim squeezed out -> 2-D kernel refs
                pl.BlockSpec((None, lq, h * hd), lambda b: (b, 0, 0)),
                pl.BlockSpec((None, lk, h * hd), lambda b: (b, 0, 0)),
                pl.BlockSpec((None, lv, h * vhd), lambda b: (b, 0, 0)),
                pl.BlockSpec((None, lq, w), lambda b: (b, 0, 0)),
                pl.BlockSpec((h * hd, h * hd), lambda b: (0, 0)),
                pl.BlockSpec((h * hd, h * hd), lambda b: (0, 0)),
                pl.BlockSpec((h * vhd, h * vhd), lambda b: (0, 0)),
                pl.BlockSpec((h * vhd, VEMBED), lambda b: (0, 0)),
                pl.BlockSpec((1, VEMBED), lambda b: (0, 0)),
            ],
            out_specs=(
                pl.BlockSpec((None, lq, VEMBED), lambda b: (b, 0, 0)),
                pl.BlockSpec((None, lq, w), lambda b: (b, 0, 0)),
            )),
        compiler_params=pltpu.CompilerParams(
            dimension_semantics=("parallel",)),
    )(q2, k2, v2, mask, wq_bd, wk_bd, wv_bd,
      params["wfc_t"], params["bfc"].reshape(1, -1))

    return out, attn


# =====================  pure-JAX reference (intended semantics)  =====================
def reference_forward(value, key, query, mask_ori, params):
    n, lq = query.shape[0], query.shape[1]
    hd, vhd = HEAD_DIM, VHEAD_DIM
    qp = jnp.einsum("nlhd,de->nlhe", query, params["wq_t"], precision=_HIGH)
    kp = jnp.einsum("nlhd,de->nlhe", key, params["wk_t"], precision=_HIGH)
    vp = jnp.einsum("nlhd,de->nlhe", value, params["wv_t"], precision=_HIGH)
    mask = mask_ori.astype(jnp.int32)
    bidx = jnp.arange(n)[:, None, None]
    outs = []
    attn = None
    for i in range(HEADS):
        k_i = jnp.concatenate([kp[:, :, i, :],
                               jnp.zeros((n, 1, hd), jnp.float32)], axis=1)
        v_i = jnp.concatenate([vp[:, :, i, :],
                               jnp.zeros((n, 1, vhd), jnp.float32)], axis=1)
        kg = k_i[bidx, mask]                                   # (N, L, W, hd)
        vg = v_i[bidx, mask]                                   # (N, L, W, vhd)
        e = jnp.einsum("nld,nlwd->nlw", qp[:, :, i, :], kg, precision=_HIGH)
        e = jnp.where(mask == LONGEST_WINDOW, -1e20, e)
        attn = jax.nn.softmax(e, axis=-1)
        outs.append(jnp.einsum("nlw,nlwd->nld", attn, vg, precision=_HIGH))
    out = jnp.concatenate(outs, axis=-1)
    out = jnp.dot(out, params["wfc_t"], precision=_HIGH) + params["bfc"]
    return out, attn.reshape(n, lq, -1)


# =====================  deterministic parameter init  =====================
def init_params(rng):
    ks = jax.random.split(rng, 5)
    wq = jax.random.normal(ks[0], (HEAD_DIM, HEAD_DIM), jnp.float32) * HEAD_DIM ** -0.5
    wk = jax.random.normal(ks[1], (HEAD_DIM, HEAD_DIM), jnp.float32) * HEAD_DIM ** -0.5
    wv = jax.random.normal(ks[2], (VHEAD_DIM, VHEAD_DIM), jnp.float32) * VHEAD_DIM ** -0.5
    wfc = jax.random.normal(ks[3], (VEMBED, HEADS * VHEAD_DIM), jnp.float32) * VEMBED ** -0.5
    bfc = jax.random.normal(ks[4], (VEMBED,), jnp.float32) * 0.1
    # store pre-transposed so kernels do x @ W.T as a plain dot
    return {"wq_t": wq.T, "wk_t": wk.T, "wv_t": wv.T, "wfc_t": wfc.T, "bfc": bfc}


if __name__ == "__main__":
    root = jax.random.PRNGKey(0)
    ks = jax.random.split(root, 6)
    value = jax.random.normal(ks[0], (N, LV, HEADS, VHEAD_DIM), jnp.float32)
    key_in = jax.random.normal(ks[1], (N, LK, HEADS, HEAD_DIM), jnp.float32)
    query = jax.random.normal(ks[2], (N, LQ, HEADS, HEAD_DIM), jnp.float32)
    # window indices in [0, LK]; index LK selects the (implicit) zero row
    # TODO(synk): exercising mask==600 masking requires key_len >= 600 (torch.gather
    # range); the masked_fill branch is implemented but not triggered at this size.
    mask = jax.random.randint(ks[3], (N, LQ, WIN), 0, LK + 1)
    params = init_params(ks[4])

    out, attn = jax.jit(self_attention_forward)(value, key_in, query, mask, params)
    out = jax.block_until_ready(out)
    attn = jax.block_until_ready(attn)

    ref_out, ref_attn = reference_forward(value, key_in, query, mask, params)
    assert out.shape == (N, LQ, VEMBED) and attn.shape == (N, LQ, WIN)
    # with HIGHEST-precision matmuls and exact softmax division both sides agree
    # to ~1e-5; tolerance leaves headroom for EUP exp / multi-pass MXU residuals
    assert jnp.allclose(out, ref_out, atol=2e-3, rtol=2e-3), \
        float(jnp.max(jnp.abs(out - ref_out)))
    assert jnp.allclose(attn, ref_attn, atol=2e-3, rtol=2e-3), \
        float(jnp.max(jnp.abs(attn - ref_attn)))
    print("KERNEL_OK")
</pallas_src>

<mosaic_0001>
module attributes {stable_mosaic.version = 11 : i64} {
  func.func @attn_fc_kernel(%arg0: i32, %arg1: memref<1x8x32xf32, #tpu.memory_space<vmem>>, %arg2: memref<1x10x32xf32, #tpu.memory_space<vmem>>, %arg3: memref<1x10x8xf32, #tpu.memory_space<vmem>>, %arg4: memref<1x8x6xi32, #tpu.memory_space<vmem>>, %arg5: memref<32x32xf32, #tpu.memory_space<vmem>>, %arg6: memref<32x32xf32, #tpu.memory_space<vmem>>, %arg7: memref<8x8xf32, #tpu.memory_space<vmem>>, %arg8: memref<8x8xf32, #tpu.memory_space<vmem>>, %arg9: memref<1x8xf32, #tpu.memory_space<vmem>>, %arg10: memref<1x8x8xf32, #tpu.memory_space<vmem>>, %arg11: memref<1x8x6xf32, #tpu.memory_space<vmem>>) attributes {dimension_semantics = [#tpu.dimension_semantics<parallel>], iteration_bounds = array<i64: 2>, scalar_prefetch = 0 : i64, scratch_operands = 0 : i64, tpu.core_type = #tpu.core_type<tc>, window_params = [{transform_indices = @transform_0, window_bounds = array<i64: 1, 8, 32>}, {transform_indices = @transform_1, window_bounds = array<i64: 1, 10, 32>}, {transform_indices = @transform_2, window_bounds = array<i64: 1, 10, 8>}, {transform_indices = @transform_3, window_bounds = array<i64: 1, 8, 6>}, {pipeline_mode = #tpu.pipeline_mode<synchronous>, transform_indices = @transform_4, window_bounds = array<i64: 32, 32>}, {pipeline_mode = #tpu.pipeline_mode<synchronous>, transform_indices = @transform_5, window_bounds = array<i64: 32, 32>}, {pipeline_mode = #tpu.pipeline_mode<synchronous>, transform_indices = @transform_6, window_bounds = array<i64: 8, 8>}, {pipeline_mode = #tpu.pipeline_mode<synchronous>, transform_indices = @transform_7, window_bounds = array<i64: 8, 8>}, {pipeline_mode = #tpu.pipeline_mode<synchronous>, transform_indices = @transform_8, window_bounds = array<i64: 1, 8>}, {transform_indices = @transform_9, window_bounds = array<i64: 1, 8, 8>}, {transform_indices = @transform_10, window_bounds = array<i64: 1, 8, 6>}]} {
    %c0 = arith.constant 0 : index
    %c0_0 = arith.constant 0 : index
    %c0_1 = arith.constant 0 : index
    %0 = vector.load %arg1[%c0, %c0_0, %c0_1] : memref<1x8x32xf32, #tpu.memory_space<vmem>>, vector<1x8x32xf32>
    %1 = vector.shape_cast %0 : vector<1x8x32xf32> to vector<8x32xf32>
    %c0_2 = arith.constant 0 : index
    %c0_3 = arith.constant 0 : index
    %c0_4 = arith.constant 0 : index
    %2 = vector.load %arg2[%c0_2, %c0_3, %c0_4] : memref<1x10x32xf32, #tpu.memory_space<vmem>>, vector<1x10x32xf32>
    %3 = vector.shape_cast %2 : vector<1x10x32xf32> to vector<10x32xf32>
    %c0_5 = arith.constant 0 : index
    %c0_6 = arith.constant 0 : index
    %c0_7 = arith.constant 0 : index
    %4 = vector.load %arg3[%c0_5, %c0_6, %c0_7] : memref<1x10x8xf32, #tpu.memory_space<vmem>>, vector<1x10x8xf32>
    %5 = vector.shape_cast %4 : vector<1x10x8xf32> to vector<10x8xf32>
    %c0_8 = arith.constant 0 : index
    %c0_9 = arith.constant 0 : index
    %c0_10 = arith.constant 0 : index
    %6 = vector.load %arg4[%c0_8, %c0_9, %c0_10] : memref<1x8x6xi32, #tpu.memory_space<vmem>>, vector<1x8x6xi32>
    %7 = vector.shape_cast %6 : vector<1x8x6xi32> to vector<8x6xi32>
    %c0_11 = arith.constant 0 : index
    %c0_12 = arith.constant 0 : index
    %8 = vector.load %arg5[%c0_11, %c0_12] : memref<32x32xf32, #tpu.memory_space<vmem>>, vector<32x32xf32>
    %cst = arith.constant dense<0.000000e+00> : vector<8x32xf32>
    %9 = tpu.matmul %1, %8, %cst {dimension_numbers = #tpu.dot_dimension_numbers<[1], [0], [0], [1], [0, 0, 1, 1], [], []>, precision = #tpu.contract_precision<fp32>} : vector<8x32xf32>, vector<32x32xf32>, vector<8x32xf32> -> vector<8x32xf32>
    %c0_13 = arith.constant 0 : index
    %c0_14 = arith.constant 0 : index
    %10 = vector.load %arg6[%c0_13, %c0_14] : memref<32x32xf32, #tpu.memory_space<vmem>>, vector<32x32xf32>
    %cst_15 = arith.constant dense<0.000000e+00> : vector<10x32xf32>
    %11 = tpu.matmul %3, %10, %cst_15 {dimension_numbers = #tpu.dot_dimension_numbers<[1], [0], [0], [1], [0, 0, 1, 1], [], []>, precision = #tpu.contract_precision<fp32>} : vector<10x32xf32>, vector<32x32xf32>, vector<10x32xf32> -> vector<10x32xf32>
    %c0_16 = arith.constant 0 : index
    %c0_17 = arith.constant 0 : index
    %12 = vector.load %arg7[%c0_16, %c0_17] : memref<8x8xf32, #tpu.memory_space<vmem>>, vector<8x8xf32>
    %cst_18 = arith.constant dense<0.000000e+00> : vector<10x8xf32>
    %13 = tpu.matmul %5, %12, %cst_18 {dimension_numbers = #tpu.dot_dimension_numbers<[1], [0], [0], [1], [0, 0, 1, 1], [], []>, precision = #tpu.contract_precision<fp32>} : vector<10x8xf32>, vector<8x8xf32>, vector<10x8xf32> -> vector<10x8xf32>
    %14 = tpu.iota {dimensions = array<i32: 2>} : vector<8x6x10xi32>
    %15 = vector.shape_cast %7 : vector<8x6xi32> to vector<8x6x1xi32>
    %16 = vector.broadcast %15 : vector<8x6x1xi32> to vector<8x6x10xi32>
    %17 = arith.cmpi eq, %14, %16 : vector<8x6x10xi32>
    %18 = arith.extui %17 : vector<8x6x10xi1> to vector<8x6x10xi32>
    %19 = arith.sitofp %18 : vector<8x6x10xi32> to vector<8x6x10xf32>
    %20 = vector.shape_cast %11 : vector<10x32xf32> to vector<1x10x32xf32>
    %21 = vector.shape_cast %20 : vector<1x10x32xf32> to vector<1x10x32xf32>
    %22 = vector.broadcast %21 : vector<1x10x32xf32> to vector<8x10x32xf32>
    %23 = vector.shape_cast %13 : vector<10x8xf32> to vector<1x10x8xf32>
    %24 = vector.shape_cast %23 : vector<1x10x8xf32> to vector<1x10x8xf32>
    %25 = vector.broadcast %24 : vector<1x10x8xf32> to vector<8x10x8xf32>
    "tpu.trace_start"() <{level = 10 : i32, message = "lwk,lkc->lwc"}> : () -> ()
    %cst_19 = arith.constant dense<0.000000e+00> : vector<8x6x32xf32>
    %26 = tpu.matmul %19, %22, %cst_19 {dimension_numbers = #tpu.dot_dimension_numbers<[2], [1], [1], [2], [0, 0, 0, 1, 1, 2], [0], [0]>, precision = #tpu.contract_precision<fp32>} : vector<8x6x10xf32>, vector<8x10x32xf32>, vector<8x6x32xf32> -> vector<8x6x32xf32>
    %cst_20 = arith.constant dense<0.000000e+00> : vector<8x6x8xf32>
    %27 = tpu.matmul %19, %25, %cst_20 {dimension_numbers = #tpu.dot_dimension_numbers<[2], [1], [1], [2], [0, 0, 0, 1, 1, 2], [0], [0]>, precision = #tpu.contract_precision<fp32>} : vector<8x6x10xf32>, vector<8x10x8xf32>, vector<8x6x8xf32> -> vector<8x6x8xf32>
    %c600_i32 = arith.constant 600 : i32
    "tpu.trace_stop"() : () -> ()
    %28 = vector.broadcast %c600_i32 : i32 to vector<8x6xi32>
    %29 = arith.cmpi eq, %7, %28 : vector<8x6xi32>
    %30 = vector.extract_strided_slice %9 {offsets = [0, 0], sizes = [8, 16], strides = [1, 1]} : vector<8x32xf32> to vector<8x16xf32>
    %31 = vector.extract_strided_slice %26 {offsets = [0, 0, 0], sizes = [8, 6, 16], strides = [1, 1, 1]} : vector<8x6x32xf32> to vector<8x6x16xf32>
    %32 = vector.extract_strided_slice %27 {offsets = [0, 0, 0], sizes = [8, 6, 4], strides = [1, 1, 1]} : vector<8x6x8xf32> to vector<8x6x4xf32>
    %33 = vector.shape_cast %30 : vector<8x16xf32> to vector<8x1x16xf32>
    %34 = vector.broadcast %33 : vector<8x1x16xf32> to vector<8x6x16xf32>
    %35 = arith.mulf %31, %34 : vector<8x6x16xf32>
    %cst_21 = arith.constant dense<0.000000e+00> : vector<8x6xf32>
    %36 = vector.multi_reduction <add>, %35, %cst_21 [2] : vector<8x6x16xf32> to vector<8x6xf32>
    %cst_22 = arith.constant -1.000000e+20 : f32
    %37 = vector.broadcast %cst_22 : f32 to vector<8x6xf32>
    %38 = arith.select %29, %37, %36 : vector<8x6xi1>, vector<8x6xf32>
    %cst_23 = arith.constant dense<0xFF800000> : vector<8xf32>
    %39 = vector.multi_reduction <maximumf>, %38, %cst_23 [1] : vector<8x6xf32> to vector<8xf32>
    %40 = vector.shape_cast %39 : vector<8xf32> to vector<8x1xf32>
    %41 = vector.broadcast %40 : vector<8x1xf32> to vector<8x6xf32>
    %42 = arith.subf %38, %41 : vector<8x6xf32>
    %43 = math.exp %42 : vector<8x6xf32>
    %cst_24 = arith.constant dense<0.000000e+00> : vector<8xf32>
    %44 = vector.multi_reduction <add>, %43, %cst_24 [1] : vector<8x6xf32> to vector<8xf32>
    %45 = vector.shape_cast %44 : vector<8xf32> to vector<8x1xf32>
    %46 = vector.broadcast %45 : vector<8x1xf32> to vector<8x6xf32>
    %47 = arith.divf %43, %46 : vector<8x6xf32>
    %48 = vector.shape_cast %47 : vector<8x6xf32> to vector<8x6x1xf32>
    %49 = vector.broadcast %48 : vector<8x6x1xf32> to vector<8x6x4xf32>
    %50 = arith.mulf %49, %32 : vector<8x6x4xf32>
    %cst_25 = arith.constant dense<0.000000e+00> : vector<8x4xf32>
    %51 = vector.multi_reduction <add>, %50, %cst_25 [1] : vector<8x6x4xf32> to vector<8x4xf32>
    %c0_26 = arith.constant 0 : index
    %c0_27 = arith.constant 0 : index
    %52 = vector.load %arg8[%c0_26, %c0_27] : memref<8x8xf32, #tpu.memory_space<vmem>>, vector<4x8xf32>
    %cst_28 = arith.constant dense<0.000000e+00> : vector<8x8xf32>
    %53 = tpu.matmul %51, %52, %cst_28 {dimension_numbers = #tpu.dot_dimension_numbers<[1], [0], [0], [1], [0, 0, 1, 1], [], []>, precision = #tpu.contract_precision<fp32>} : vector<8x4xf32>, vector<4x8xf32>, vector<8x8xf32> -> vector<8x8xf32>
    %54 = vector.extract_strided_slice %9 {offsets = [0, 16], sizes = [8, 16], strides = [1, 1]} : vector<8x32xf32> to vector<8x16xf32>
    %55 = vector.extract_strided_slice %26 {offsets = [0, 0, 16], sizes = [8, 6, 16], strides = [1, 1, 1]} : vector<8x6x32xf32> to vector<8x6x16xf32>
    %56 = vector.extract_strided_slice %27 {offsets = [0, 0, 4], sizes = [8, 6, 4], strides = [1, 1, 1]} : vector<8x6x8xf32> to vector<8x6x4xf32>
    %57 = vector.shape_cast %54 : vector<8x16xf32> to vector<8x1x16xf32>
    %58 = vector.broadcast %57 : vector<8x1x16xf32> to vector<8x6x16xf32>
    %59 = arith.mulf %55, %58 : vector<8x6x16xf32>
    %cst_29 = arith.constant dense<0.000000e+00> : vector<8x6xf32>
    %60 = vector.multi_reduction <add>, %59, %cst_29 [2] : vector<8x6x16xf32> to vector<8x6xf32>
    %cst_30 = arith.constant -1.000000e+20 : f32
    %61 = vector.broadcast %cst_30 : f32 to vector<8x6xf32>
    %62 = arith.select %29, %61, %60 : vector<8x6xi1>, vector<8x6xf32>
    %cst_31 = arith.constant dense<0xFF800000> : vector<8xf32>
    %63 = vector.multi_reduction <maximumf>, %62, %cst_31 [1] : vector<8x6xf32> to vector<8xf32>
    %64 = vector.shape_cast %63 : vector<8xf32> to vector<8x1xf32>
    %65 = vector.broadcast %64 : vector<8x1xf32> to vector<8x6xf32>
    %66 = arith.subf %62, %65 : vector<8x6xf32>
    %67 = math.exp %66 : vector<8x6xf32>
    %cst_32 = arith.constant dense<0.000000e+00> : vector<8xf32>
    %68 = vector.multi_reduction <add>, %67, %cst_32 [1] : vector<8x6xf32> to vector<8xf32>
    %69 = vector.shape_cast %68 : vector<8xf32> to vector<8x1xf32>
    %70 = vector.broadcast %69 : vector<8x1xf32> to vector<8x6xf32>
    %71 = arith.divf %67, %70 : vector<8x6xf32>
    %72 = vector.shape_cast %71 : vector<8x6xf32> to vector<8x6x1xf32>
    %73 = vector.broadcast %72 : vector<8x6x1xf32> to vector<8x6x4xf32>
    %74 = arith.mulf %73, %56 : vector<8x6x4xf32>
    %cst_33 = arith.constant dense<0.000000e+00> : vector<8x4xf32>
    %75 = vector.multi_reduction <add>, %74, %cst_33 [1] : vector<8x6x4xf32> to vector<8x4xf32>
    %c4 = arith.constant 4 : index
    %c0_34 = arith.constant 0 : index
    %76 = vector.load %arg8[%c4, %c0_34] : memref<8x8xf32, #tpu.memory_space<vmem>>, vector<4x8xf32>
    %cst_35 = arith.constant dense<0.000000e+00> : vector<8x8xf32>
    %77 = tpu.matmul %75, %76, %cst_35 {dimension_numbers = #tpu.dot_dimension_numbers<[1], [0], [0], [1], [0, 0, 1, 1], [], []>, precision = #tpu.contract_precision<fp32>} : vector<8x4xf32>, vector<4x8xf32>, vector<8x8xf32> -> vector<8x8xf32>
    %78 = arith.addf %53, %77 : vector<8x8xf32>
    %c0_36 = arith.constant 0 : index
    %c0_37 = arith.constant 0 : index
    %79 = vector.load %arg9[%c0_36, %c0_37] : memref<1x8xf32, #tpu.memory_space<vmem>>, vector<1x8xf32>
    %80 = vector.broadcast %79 : vector<1x8xf32> to vector<8x8xf32>
    %81 = arith.addf %78, %80 : vector<8x8xf32>
    %c0_38 = arith.constant 0 : index
    %c0_39 = arith.constant 0 : index
    %c0_40 = arith.constant 0 : index
    %82 = vector.load %arg10[%c0_38, %c0_39, %c0_40] : memref<1x8x8xf32, #tpu.memory_space<vmem>>, vector<1x8x8xf32>
    %83 = vector.shape_cast %82 : vector<1x8x8xf32> to vector<8x8xf32>
    %84 = vector.shape_cast %81 : vector<8x8xf32> to vector<1x8x8xf32>
    tpu.vector_store %arg10[%c0_38, %c0_39, %c0_40], %84 {strides = array<i32>} : memref<1x8x8xf32, #tpu.memory_space<vmem>>, vector<1x8x8xf32>,
    %c0_41 = arith.constant 0 : index
    %c0_42 = arith.constant 0 : index
    %c0_43 = arith.constant 0 : index
    %85 = vector.load %arg11[%c0_41, %c0_42, %c0_43] : memref<1x8x6xf32, #tpu.memory_space<vmem>>, vector<1x8x6xf32>
    %86 = vector.shape_cast %85 : vector<1x8x6xf32> to vector<8x6xf32>
    %87 = vector.shape_cast %71 : vector<8x6xf32> to vector<1x8x6xf32>
    tpu.vector_store %arg11[%c0_41, %c0_42, %c0_43], %87 {strides = array<i32>} : memref<1x8x6xf32, #tpu.memory_space<vmem>>, vector<1x8x6xf32>,
    return
  }
  func.func @transform_0(%arg0: i32) -> (i32, i32, i32) {
    %c0_i32 = arith.constant 0 : i32
    %c0_i32_0 = arith.constant 0 : i32
    %c0_i32_1 = arith.constant 0 : i32
    return %arg0, %c0_i32, %c0_i32_0 : i32, i32, i32
  }
  func.func @transform_1(%arg0: i32) -> (i32, i32, i32) {
    %c0_i32 = arith.constant 0 : i32
    %c0_i32_0 = arith.constant 0 : i32
    %c0_i32_1 = arith.constant 0 : i32
    return %arg0, %c0_i32, %c0_i32_0 : i32, i32, i32
  }
  func.func @transform_2(%arg0: i32) -> (i32, i32, i32) {
    %c0_i32 = arith.constant 0 : i32
    %c0_i32_0 = arith.constant 0 : i32
    %c0_i32_1 = arith.constant 0 : i32
    return %arg0, %c0_i32, %c0_i32_0 : i32, i32, i32
  }
  func.func @transform_3(%arg0: i32) -> (i32, i32, i32) {
    %c0_i32 = arith.constant 0 : i32
    %c0_i32_0 = arith.constant 0 : i32
    %c0_i32_1 = arith.constant 0 : i32
    return %arg0, %c0_i32, %c0_i32_0 : i32, i32, i32
  }
  func.func @transform_4(%arg0: i32) -> (i32, i32) {
    %c0_i32 = arith.constant 0 : i32
    %c0_i32_0 = arith.constant 0 : i32
    %c0_i32_1 = arith.constant 0 : i32
    return %c0_i32, %c0_i32_0 : i32, i32
  }
  func.func @transform_5(%arg0: i32) -> (i32, i32) {
    %c0_i32 = arith.constant 0 : i32
    %c0_i32_0 = arith.constant 0 : i32
    %c0_i32_1 = arith.constant 0 : i32
    return %c0_i32, %c0_i32_0 : i32, i32
  }
  func.func @transform_6(%arg0: i32) -> (i32, i32) {
    %c0_i32 = arith.constant 0 : i32
    %c0_i32_0 = arith.constant 0 : i32
    %c0_i32_1 = arith.constant 0 : i32
    return %c0_i32, %c0_i32_0 : i32, i32
  }
  func.func @transform_7(%arg0: i32) -> (i32, i32) {
    %c0_i32 = arith.constant 0 : i32
    %c0_i32_0 = arith.constant 0 : i32
    %c0_i32_1 = arith.constant 0 : i32
    return %c0_i32, %c0_i32_0 : i32, i32
  }
  func.func @transform_8(%arg0: i32) -> (i32, i32) {
    %c0_i32 = arith.constant 0 : i32
    %c0_i32_0 = arith.constant 0 : i32
    %c0_i32_1 = arith.constant 0 : i32
    return %c0_i32, %c0_i32_0 : i32, i32
  }
  func.func @transform_9(%arg0: i32) -> (i32, i32, i32) {
    %c0_i32 = arith.constant 0 : i32
    %c0_i32_0 = arith.constant 0 : i32
    %c0_i32_1 = arith.constant 0 : i32
    return %arg0, %c0_i32, %c0_i32_0 : i32, i32, i32
  }
  func.func @transform_10(%arg0: i32) -> (i32, i32, i32) {
    %c0_i32 = arith.constant 0 : i32
    %c0_i32_0 = arith.constant 0 : i32
    %c0_i32_1 = arith.constant 0 : i32
    return %arg0, %c0_i32, %c0_i32_0 : i32, i32, i32
  }
}

</mosaic_0001>

<bundles_post_ra>
// kernel: self_attention_forward.1
= control target key start
LH: loop header
LB: loop body
LE: loop exit
PB: predicated region body
PF: predicated region fallthrough
CT: control target
= control target key end

     0   :  { %16 = vsyncpa [#allocation3], 0  ;;  %s14510_s0 = inlined_call_operand.vmem [shape: f32[2,8,32], index: 0, kind: input, shape index: {}]   ;;  %s14511_s1 = inlined_call_operand.vmem [shape: f32[2,10,32], index: 1, kind: input, shape index: {}]   ;;  %s14512_s2 = inlined_call_operand.vmem [shape: f32[2,10,8], index: 2, kind: input, shape index: {}]   ;;  %s14513_s3 = inlined_call_operand.vmem [shape: s32[2,8,6], index: 3, kind: input, shape index: {}]   ;;  %s14514_s4 = inlined_call_operand.vmem [shape: f32[32,32], index: 4, kind: input, shape index: {}]   ;;  %s14515_s5 = inlined_call_operand.vmem [shape: f32[32,32], index: 5, kind: input, shape index: {}]   ;;  %s14516_s6 = inlined_call_operand.vmem [shape: f32[8,8], index: 6, kind: input, shape index: {}]   ;;  %s14517_s7 = inlined_call_operand.vmem [shape: f32[8,8], index: 7, kind: input, shape index: {}]   ;;  %s14518_s8 = inlined_call_operand.vmem [shape: f32[1,8], index: 8, kind: input, shape index: {}]   ;;  %s14519_s9 = inlined_call_operand.hbm [shape: f32[2,8,8], index: 9, kind: output, shape index: {0}]   ;;  %s14520_s10 = inlined_call_operand.vmem [shape: f32[2,8,6], index: 10, kind: output, shape index: {1}]  }
   0x1   :  { %18 = vsyncpa [#allocation3 + $0x1], 0  ;;  %s13160_s13 = smov 0   ;;  %s13162_s14 = smov 0  }
   0x2   :  { %s13164_s15 = smov 0   ;;  %s13166_s16 = smov 0  }
   0x3 LB: > { %s13181_s17 = sadd.s32 4294967295, %s13096_s16   ;;  %s11053_s18 = sadd.s32 4294967294, %s13096_s16   ;;  %s13096_s16 = sphi %s13166_s16, %s14526_s16   ;;  %s13092_s15 = sphi %s13164_s15, %s14525_s15   ;;  %s13088_s14 = sphi %s13162_s14, %s14524_s14   ;;  %s13084_s13 = sphi %s13160_s13, %s14523_s13  }
   0x4   : > { %s13185_s19 = sadd.s32 1, %s13096_s16   ;;  %s240_s20 = sadd.s32 1, %s13092_s15 }
   0x5   : > { %s237_s21 = ssub.s32 %s13096_s16, %s13185_s19  ;;  %p250_p0 = scmp.ne.s32.totalorder %s13092_s15, %s13088_s14 }
   0x6   : > { %p238_p1 = scmp.eq.s32.totalorder %s237_s21, 0  ;;  %p251_p2 = scmp.eq.s32.totalorder %s13181_s17, 1 }
   0x7   : > { %p256_p3 = scmp.ne.s32.totalorder %s13088_s14, %s13084_s13  ;;  %p257_p4 = scmp.eq.s32.totalorder %s11053_s18, 1 }
   0x8   : > { %s13196_s22 = scalar_select %p238_p1, %s13092_s15, %s240_s20  }
   0x9   : > { %p13198_p5 = por %p251_p2, %p250_p0  ;;  %p13202_p6 = por %p257_p4, %p256_p3 }
   0xa   : > { %p11056_p7 = scmp.ge.s32.totalorder %s13096_s16, 1  ;;  %p346_p8 = scmp.lt.s32.totalorder %s13096_s16, 3 }
   0xc   : > { %p347_p9 = pnand %p11056_p7, %p346_p8 }
   0xd   : > { %v922_v0 = vld [vmem:[%s14515_s5] sm:$0xff] (!%p347_p9)  ;;  %v923_v1 = vld [vmem:[%s14515_s5 + $0x8] sm:$0xff] (!%p347_p9)  ;;  %v924_v2 = vld [vmem:[%s14515_s5 + $0x10] sm:$0xff] (!%p347_p9)  ;;  %p401_p10 = scmp.lt.s32.totalorder (!%p347_p9), %s13181_s17, 1  ;;  %v13098_v9 = vmov (!%p347_p9), 0.0|0.0   ;;  %vm433_vm0 = vcmask (!%p347_p9), 261120   ;;  %v1957_v37 = vlaneseq (!%p347_p9) }
   0xe   : > { %350 = sbr.rel (%p347_p9) target bundleno = 1819 (0x71b), region = 56  ;;  %v933_v3 = vand.u32 (!%p347_p9), 4294901760, %v922_v0  ;;  %v936_v4 = vand.u32 (!%p347_p9), 4294901760, %v923_v1  ;;  %v925_v5 = vld [vmem:[%s14515_s5 + $0x18] sm:$0xff] (!%p347_p9)  ;;  %v939_v6 = vand.u32 (!%p347_p9), 4294901760, %v924_v2  ;;  %v429_v7 = vld [vmem:[%s14514_s4] sm:$0xff] (!%p347_p9)  ;;  %12418 = vmatprep.subr.bf16.mxu0 (!%p347_p9), %v13098_v9 }
   0xf   : > { %v942_v8 = vand.u32 (!%p347_p9), 4294901760, %v925_v5  ;;  %v430_v10 = vld [vmem:[%s14514_s4 + $0x8] sm:$0xff] (!%p347_p9)  ;;  %v438_v11 = vand.u32 (!%p347_p9), 4294901760, %v429_v7  ;;  %v431_v32 = vld [vmem:[%s14514_s4 + $0x10] sm:$0xff] (!%p347_p9)  ;;  %v432_v33 = vld [vmem:[%s14514_s4 + $0x18] sm:$0xff] (!%p347_p9)  ;;  %v13323_v56 = vshrl.u32 (!%p347_p9), %v1957_v37, 7 }
  0x10   : > { %v13231_v12 = vpack.c.bf16 (!%p347_p9), %v936_v4, %v933_v3  ;;  %v13233_v13 = vsub.f32 (!%p347_p9), %v922_v0, %v933_v3  ;;  %v13235_v14 = vsub.f32 (!%p347_p9), %v923_v1, %v936_v4  ;;  %v13237_v15 = vsub.f32 (!%p347_p9), %v924_v2, %v939_v6  ;;  %s13102_s28 = smov (!%p347_p9), 112   ;;  %s13103_s20 = smov (!%p347_p9), 124  }
  0x11   : > { %v13239_v16 = vpack.c.bf16 (!%p347_p9), %v942_v8, %v939_v6  ;;  %v13242_v17 = vsub.f32 (!%p347_p9), %v925_v5, %v942_v8  ;;  %v441_v18 = vand.u32 (!%p347_p9), 4294901760, %v430_v10  ;;  %v13298_v41 = vsub.f32 (!%p347_p9), %v429_v7, %v438_v11 }
  0x12   : > { %12455 = vmatprep.subr.bf16.mxu1 (!%p347_p9), %v13231_v12  ;;  %v1024_v19 = vand.u32 (!%p347_p9), 4294901760, %v13233_v13  ;;  %v1031_v20 = vand.u32 (!%p347_p9), 4294901760, %v13235_v14  ;;  %v1038_v21 = vand.u32 (!%p347_p9), 4294901760, %v13237_v15  ;;  %v444_v44 = vand.u32 (!%p347_p9), 4294901760, %v431_v32 }
  0x13   : > { %12457 = vmatpush3.bf16.msra.mxu1 (!%p347_p9), %v13231_v12  ;;  %v1045_v24 = vand.u32 (!%p347_p9), 4294901760, %v13242_v17  ;;  %v13258_v25 = vpack.c.bf16 (!%p347_p9), %v441_v18, %v438_v11  ;;  %v13300_v43 = vsub.f32 (!%p347_p9), %v430_v10, %v441_v18  ;;  %v447_v45 = vand.u32 (!%p347_p9), 4294901760, %v432_v33 }
  0x14   : > { %12459 = vmatprep.subr.bf16.mxu1 (!%p347_p9), %v13239_v16  ;;  %v1025_v28 = vsub.f32 (!%p347_p9), %v13233_v13, %v1024_v19  ;;  %v1032_v31 = vsub.f32 (!%p347_p9), %v13235_v14, %v1031_v20  ;;  %v1039_v35 = vsub.f32 (!%p347_p9), %v13237_v15, %v1038_v21  ;;  %v13312_v52 = vsub.f32 (!%p347_p9), %v431_v32, %v444_v44 }
  0x15   : > { %s13225_s21 = scalar_select %p401_p10, %s13181_s17, 1  ;;  %12420 = vmatpush3.bf16.msra.mxu0 %v13258_v25  ;;  %v1046_v36 = vsub.f32 %v13242_v17, %v1045_v24  ;;  %v13310_v51 = vpack.c.bf16 %v447_v45, %v444_v44  ;;  %v13314_v53 = vsub.f32 %v432_v33, %v447_v45  ;;  %vm13099_vm1 = vmmov 0  }
  0x16   : > { %v1026_v34 = vand.u32 4294901760, %v1025_v28  ;;  %12421 = vmatprep.subr.bf16.mxu0 %v13098_v9  ;;  %v1033_v40 = vand.u32 4294901760, %v1032_v31  ;;  %v1040_v42 = vand.u32 4294901760, %v1039_v35  ;;  %v13100_v58 = vmov 0.0  }
  0x17   : > { %s11126_s27 = sshll.u32 %s13225_s21, 4  ;;  %s13255_s11 = sshll.u32 %s13225_s21, 3  ;;  %12461 = vmatpush3.bf16.msra.mxu1 %v13239_v16  ;;  %v1047_v50 = vand.u32 4294901760, %v1046_v36  ;;  %11532 = vmatprep.mubr.msk.f32.mxu0 %vm13099_vm1, %v13100_v58  ;;  %v519_v60 = vand.u32 4294901760, %v13298_v41  ;;  %v526_v61 = vand.u32 4294901760, %v13300_v43  ;;  %v533_v62 = vand.u32 4294901760, %v13312_v52 }
  0x18   : > { %s409_s30 = scalar_lea.vmem %s14511_s1, %s11126_s27  ;;  %s404_s29 = scalar_lea.vmem %s14510_s0, %s13255_s11  ;;  %v12462_v48 = vpack.c.bf16 %v1033_v40, %v1026_v34  ;;  %v13336_v1 = vsub.s32 0, %v13323_v56  ;;  %v13348_v6 = vsub.s32 1, %v13323_v56  ;;  %v540_v11 = vand.u32 4294901760, %v13314_v53 }
  0x19   : > { %v424_v22 = vld [vmem:[%s409_s30] sm:$0xff]  ;;  %v425_v23 = vld [vmem:[%s409_s30 + $0x8] sm:$0x3]  ;;  %s13306_s18 = scalar_lea.vmem %s14513_s3, %s13255_s11  ;;  %12423 = vmatpush3.bf16.msra.mxu0 %v13310_v51  ;;  %v12466_v3 = vpack.c.bf16 %v1047_v50, %v1040_v42  ;;  %v520_v4 = vsub.f32 %v13298_v41, %v519_v60  ;;  %v527_v5 = vsub.f32 %v13300_v43, %v526_v61  ;;  %v534_v10 = vsub.f32 %v13312_v52, %v533_v62  ;;  %s414_s26 = scalar_lea.vmem %s14512_s2, %s11126_s27 }
  0x1a   : > { %v927_v26 = vsel %vm433_vm0, %v424_v22, 0  ;;  %v930_v27 = vsel %vm433_vm0, %v425_v23, 0  ;;  %v423_v49 = vld [vmem:[%s404_s29] sm:$0xff]  ;;  %12463 = vmatprep.subr.bf16.mxu1 %v12462_v48  ;;  %12424 = vmatprep.subr.bf16.mxu0 %v13098_v9  ;;  %v13369_v31 = vsub.s32 2, %v13323_v56  ;;  %v13377_v40 = vsub.s32 3, %v13323_v56  ;;  %s422_s12 = scalar_lea.vmem %s14520_s10, %s13255_s11  ;;  %s392_s21 = sand.u32 1, %s13088_s14  }
  0x1b   : > { %v13266_v29 = vand.u32 4294901760, %v927_v26  ;;  %v13268_v30 = vand.u32 4294901760, %v930_v27  ;;  %v13326_v57 = vld [vmem:[%s13306_s18] sm:$0xff]  ;;  %v435_v59 = vsel %vm433_vm0, %v423_v49, 0  ;;  %v521_v18 = vand.u32 4294901760, %v520_v4  ;;  %s11057_s27 = sshll.u32 %s392_s21, 3 }
  0x1c   : > { %v13338_v2 = vand.u32 4294901760, %v435_v59  ;;  %v1962_v7 = vrot.slane %v13326_v57, %v13336_v1  ;;  %v528_v22 = vand.u32 4294901760, %v527_v5  ;;  %v1969_v28 = vrot.slane %v13326_v57, %v13348_v6  ;;  %s11123_s30 = sshll.u32 %s13181_s17, 7  ;;  %s13104_s17 = smov [#allocation2]  }
  0x1d   : > { %v13293_v38 = vsub.f32 %v927_v26, %v13266_v29  ;;  %v13296_v39 = vsub.f32 %v930_v27, %v13268_v30  ;;  %v541_v26 = vsub.f32 %v13314_v53, %v540_v11  ;;  %v12470_v27 = vpack.c.bf16 %v13235_v14, %v13233_v13  ;;  %v426_v14 = vld [vmem:[%s414_s26] sm:$0xff]  ;;  %s14467_s25 = scalar_lea.hbm %s14519_s9, %s11123_s30 }
  0x1e   : > { %v13353_v8 = vsub.f32 %v435_v59, %v13338_v2  ;;  %1964 = vbcast.lane.b32.xlu0 %v1962_v7, 256  ;;  %v535_v33 = vand.u32 4294901760, %v534_v10  ;;  %v12425_v34 = vpack.c.bf16 %v528_v22, %v521_v18  ;;  %v1976_v36 = vrot.slane %v13326_v57, %v13369_v31 }
  0x1f   : > { %v1003_v46 = vand.u32 4294901760, %v13293_v38  ;;  %v1013_v47 = vand.u32 4294901760, %v13296_v39  ;;  %v542_v35 = vand.u32 4294901760, %v541_v26  ;;  %v12474_v44 = vpack.c.bf16 %v13242_v17, %v13237_v15  ;;  %v1460_v15 = vld [vmem:[%s14516_s6] sm:$0xff] }
  0x20   : > { %v508_v23 = vand.u32 4294901760, %v13353_v8  ;;  %v13382_v45 = vsub.s32 4, %v13323_v56  ;;  %1978 = vbcast.lane.b32.xlu1 %v1976_v36, 256  ;;  %v13387_v49 = vsub.s32 5, %v13323_v56  ;;  %v12431_v59 = vpack.c.bf16 %v13300_v43, %v13298_v41 }
  0x21   : > { %v1004_v54 = vsub.f32 %v13293_v38, %v1003_v46  ;;  %v1014_v55 = vsub.f32 %v13296_v39, %v1013_v47  ;;  %v12428_v50 = vpack.c.bf16 %v542_v35, %v535_v33  ;;  %vm1461_vm2 = vcmask 64512  }
  0x22   : > { %v509_v32 = vsub.f32 %v13353_v8, %v508_v23  ;;  %1971 = vbcast.lane.b32.xlu0 %v1969_v28, 256  ;;  %v12490_v13 = vpack.c.bf16 %v1045_v24, %v1038_v21  ;;  %v12443_v21 = vpack.c.bf16 %v526_v61, %v519_v60  ;;  %v12446_v41 = vpack.c.bf16 %v540_v11, %v533_v62 }
  0x23   : > { %v1005_v63 = vand.u32 4294901760, %v1004_v54  ;;  %v1015_v0 = vand.u32 4294901760, %v1014_v55  ;;  %v1990_v54 = vrot.slane %v13326_v57, %v13382_v45  ;;  %v1997_v55 = vrot.slane %v13326_v57, %v13387_v49 }
  0x24   : > { %v510_v42 = vand.u32 4294901760, %v509_v32  ;;  %v13488_v7 = vand.u32 127, %v1957_v37  ;;  %vm2039_vm5 = vcmask 80896   ;;  %vm2043_vm6 = vcmask 1041408  }
  0x25   : > { %11598 = vmatprep.mubr.f32.mxu1 %v1005_v63  ;;  %v12434_v63 = vpack.c.bf16 %v13314_v53, %v13312_v52  ;;  %v13101_v33 = vmov 1966171168   ;;  %vm9514_vm13 = vcmask 128000   ;;  %vm9579_vm14 = vcmask 1041409  }
  0x26   : > { %11599 = vmatmul.mubr.f32.vlgmr.msra.gmra.mrb[0].mxu1 %v1015_v0  ;;  %11533 = vmatmul.mubr.f32.vlgmr.msra.gmra.mrb[0].mxu0 %v510_v42  ;;  %v12486_v0 = vpack.c.bf16 %v1031_v20, %v1024_v19  ;;  %v427_v19 = vld [vmem:[%s414_s26 + $0x8] sm:$0x3]  ;;  %v1463_v20 = vsel %vm1461_vm2, %v426_v14, 0  ;;  %vm9581_vm15 = vcmask 1042434   ;;  %vm9583_vm0 = vcmask 1043459   ;;  %s10914_s26 = scalar_lea.sflag [#allocation3], %s392_s21 }
  0x27   : > { %12465 = vmatpush3.bf16.msra.mxu1 %v12462_v48  ;;  %11609 = vmatprep.mubr.f32.mxu1 %v13266_v29  ;;  %v1983_v48 = vrot.slane %v13326_v57, %v13377_v40  ;;  %v1466_v17 = vsel %vm1461_vm2, %v427_v19, 0  ;;  %v1534_v24 = vand.u32 4294901760, %v1463_v20 }
  0x28   : > { %12467 = vmatprep.subr.bf16.mxu1 %v12466_v3  ;;  %12426 = vmatpush3.bf16.msra.mxu0 %v12425_v34  ;;  %v9419_v34 = vunpack.c.l.s4 %v13101_v33 }
  0x29   : > { %12427 = vmatprep.subr.bf16.mxu0 %v13098_v9  ;;  %11543 = vmatprep.mubr.msk.f32.mxu0 %vm13099_vm1, %v13100_v58  ;;  %v1535_v43 = vsub.f32 %v1463_v20, %v1534_v24 }
  0x2a   : > { %1985 = vbcast.lane.b32.xlu1 %v1983_v48, 256  ;;  %1992 = vbcast.lane.b32.xlu0 %v1990_v54, 256 }
  0x2b   : > { %12469 = vmatpush3.bf16.msra.mxu1 %v12466_v3  ;;  %v1536_v60 = vand.u32 4294901760, %v1535_v43 }
  0x2c   : > { %12471 = vmatprep.subr.bf16.mxu1 %v12470_v27  ;;  %12429 = vmatpush3.bf16.msra.mxu0 %v12428_v50 }
  0x2d   : > { %12430 = vmatprep.subr.bf16.mxu0 %v13098_v9 }
  0x2e   : > { %11610 = vmatmul.mubr.f32.vlgmr.msra.gmra.mrb[0].mxu1 %v13268_v30  ;;  %1999 = vbcast.lane.b32.xlu1 %v1997_v55, 256 }
  0x2f   : > { %12473 = vmatpush3.bf16.msra.mxu1 %v12470_v27  ;;  %11620 = vmatprep.mubr.f32.mxu1 %v13293_v38  ;;  %v1469_v38 = vand.u32 4294901760, %v1460_v15 }
  0x30   : > { %12475 = vmatprep.subr.bf16.mxu1 %v12474_v44  ;;  %11544 = vmatmul.mubr.f32.vlgmr.msra.gmra.mrb[0].mxu0 %v13338_v2 }
  0x31   : > { %12432 = vmatpush3.bf16.msra.mxu0 %v12431_v59  ;;  %11554 = vmatprep.mubr.msk.f32.mxu0 %vm13099_vm1, %v13100_v58 }
  0x32   : > { %12433 = vmatprep.subr.bf16.mxu0 %v13098_v9 }
  0x33   : > { %12477 = vmatpush3.bf16.msra.mxu1 %v12474_v44  ;;  %v9420_v44 = vunpack.c.0.s8 %v9419_v34 }
  0x34   : > { %12479 = vmatprep.subr.bf16.mxu1 %v13231_v12 }
  0x35   : > { %12435 = vmatpush3.bf16.msra.mxu0 %v12434_v63  ;;  %v13532_v19 = vsub.s32 %v9420_v44, %v13323_v56 }
  0x36   : > { %11621 = vmatmul.mubr.f32.vlgmr.msra.gmra.mrb[0].mxu1 %v13296_v39  ;;  %12436 = vmatprep.subr.bf16.mxu0 %v13098_v9  ;;  %v1544_v39 = vand.u32 4294901760, %v1466_v17 }
  0x37   : > { %12481 = vmatpush3.bf16.msra.mxu1 %v13231_v12  ;;  %11631 = vmatprep.mubr.f32.mxu1 %v1003_v46  ;;  %v1556_v46 = vsub.f32 %v1460_v15, %v1469_v38 }
  0x38   : > { %12483 = vmatprep.subr.bf16.mxu1 %v13239_v16  ;;  %11555 = vmatmul.mubr.f32.vlgmr.msra.gmra.mrb[0].mxu0 %v13353_v8 }
  0x39   : > { %12438 = vmatpush3.bf16.msra.mxu0 %v13258_v25  ;;  %11565 = vmatprep.mubr.msk.f32.mxu0 %vm13099_vm1, %v13100_v58  ;;  %v1557_v52 = vand.u32 4294901760, %v1556_v46 }
  0x3a   : > { %12439 = vmatprep.subr.bf16.mxu0 %v13098_v9 }
  0x3b   : > { %12485 = vmatpush3.bf16.msra.mxu1 %v13239_v16  ;;  %v1558_v53 = vsub.f32 %v1556_v46, %v1557_v52 }
  0x3c   : > { %12487 = vmatprep.subr.bf16.mxu1 %v12486_v0 }
  0x3d   : > { %12441 = vmatpush3.bf16.msra.mxu0 %v13310_v51  ;;  %v1559_v62 = vand.u32 4294901760, %v1558_v53 }
  0x3e   : > { %11632 = vmatmul.mubr.f32.vlgmr.msra.gmra.mrb[0].mxu1 %v1013_v47  ;;  %12442 = vmatprep.subr.bf16.mxu0 %v13098_v9  ;;  %v1545_v47 = vsub.f32 %v1466_v17, %v1544_v39 }
  0x3f   : > { %12489 = vmatpush3.bf16.msra.mxu1 %v12486_v0  ;;  %11642 = vmatprep.mubr.f32.mxu1 %v13266_v29 }
  0x40   : > { %12491 = vmatprep.subr.bf16.mxu1 %v12490_v13  ;;  %11566 = vmatmul.mubr.f32.vlgmr.msra.gmra.mrb[0].mxu0 %v508_v23 }
  0x41   : > { %12444 = vmatpush3.bf16.msra.mxu0 %v12443_v21  ;;  %11576 = vmatprep.mubr.msk.f32.mxu0 %vm13099_vm1, %v13100_v58 }
  0x42   : > { %12445 = vmatprep.subr.bf16.mxu0 %v13098_v9 }
  0x43   : > { %12493 = vmatpush3.bf16.msra.mxu1 %v12490_v13 }
  0x44   : > { %12495 = vmatprep.subr.bf16.mxu1 %v13231_v12 }
  0x45   : > { %12447 = vmatpush3.bf16.msra.mxu0 %v12446_v41 }
  0x46   : > { %11643 = vmatmul.mubr.f32.vlgmr.msra.gmra.mrb[0].mxu1 %v13268_v30  ;;  %12448 = vmatprep.subr.bf16.mxu0 %v13098_v9 }
  0x47   : > { %12497 = vmatpush3.bf16.msra.mxu1 %v13231_v12  ;;  %11653 = vmatprep.mubr.f32.mxu1 %v13266_v29  ;;  %v1546_v12 = vand.u32 4294901760, %v1545_v47  ;;  %v1537_v29 = vsub.f32 %v1535_v43, %v1536_v60 }
  0x48   : > { %12499 = vmatprep.subr.bf16.mxu1 %v13239_v16  ;;  %11577 = vmatmul.mubr.f32.vlgmr.msra.gmra.mrb[0].mxu0 %v13338_v2 }
  0x49   : > { %12450 = vmatpush3.bf16.msra.mxu0 %v13258_v25  ;;  %11587 = vmatprep.mubr.msk.f32.mxu0 %vm13099_vm1, %v13100_v58  ;;  %v1538_v61 = vand.u32 4294901760, %v1537_v29  ;;  %v13478_v25 = vsub.s32 6, %v13323_v56 }
  0x4a   : > { %12451 = vmatprep.subr.bf16.mxu0 %v13098_v9 }
  0x4b   : > { %12501 = vmatpush3.bf16.msra.mxu1 %v13239_v16  ;;  %v1547_v16 = vsub.f32 %v1545_v47, %v1546_v12 }
  0x4c   : > { %12502 = vmatprep.subr.bf16.mxu1 %v13098_v9 }
  0x4d   : > { %12453 = vmatpush3.bf16.msra.mxu0 %v13310_v51  ;;  %v13481_v51 = vsub.s32 7, %v13323_v56 }
  0x4e   : > { %11654 = vmatmul.mubr.f32.vlgmr.msra.gmra.mrb[0].mxu1 %v13268_v30  ;;  %11656 = vmatprep.subr.mxu0 %v1469_v38  ;;  %v1548_v30 = vand.u32 4294901760, %v1547_v16 }
  0x4f   : > { %11690 = vmatprep.mubr.msk.f32.mxu1 %vm13099_vm1, %v13100_v58  ;;  %v2011_v3 = vrot.slane %v13326_v57, %v13481_v51 }
  0x50   : > { %11588 = vmatmul.mubr.f32.vlgmr.msra.gmra.mrb[0].mxu0 %v13338_v2  ;;  %v2004_v2 = vrot.slane %v13326_v57, %v13478_v25 }
  0x51   : > { %11657 = vmatpush3.msra.mxu0 %v1469_v38  ;;  %11658 = vmatprep.mubr.f32.mxu0 %v1538_v61 }
  0x52   : > { %11661 = vmatprep.subr.mxu0 %v1559_v62  ;;  %2006 = vbcast.lane.b32.xlu0 %v2004_v2, 256 }
  0x53   : > { %2013 = vbcast.lane.b32.xlu1 %v2011_v3, 256 }
  0x54   : > { %11659 = vmatmul.mubr.f32.vlgmr.msra.gmra.mrb[2].mxu0 %v1548_v30 }
  0x55   : > { %11662 = vmatpush3.msra.mxu0 %v1559_v62  ;;  %11663 = vmatprep.mubr.f32.mxu0 %v1534_v24 }
  0x56   : > { %11666 = vmatprep.subr.mxu0 %v1556_v46 }
  0x5c   : > { %11664 = vmatmul.mubr.f32.vlgmr.msra.gmra.mrb[2].mxu0 %v1544_v39 }
  0x5d   : > { %11667 = vmatpush3.msra.mxu0 %v1556_v46  ;;  %11668 = vmatprep.mubr.f32.mxu0 %v1535_v43 }
  0x5e   : > { %11671 = vmatprep.subr.mxu0 %v1469_v38 }
  0x64   : > { %11669 = vmatmul.mubr.f32.vlgmr.msra.gmra.mrb[2].mxu0 %v1545_v47 }
  0x65   : > { %11672 = vmatpush3.msra.mxu0 %v1469_v38  ;;  %11673 = vmatprep.mubr.f32.mxu0 %v1536_v60 }
  0x66   : > { %11676 = vmatprep.subr.mxu0 %v1557_v52 }
  0x6c   : > { %11674 = vmatmul.mubr.f32.vlgmr.msra.gmra.mrb[2].mxu0 %v1546_v12 }
  0x6d   : > { %11677 = vmatpush3.msra.mxu0 %v1557_v52  ;;  %11678 = vmatprep.mubr.f32.mxu0 %v1534_v24 }
  0x6e   : > { %11681 = vmatprep.subr.mxu0 %v1469_v38 }
  0x74   : > { %11679 = vmatmul.mubr.f32.vlgmr.msra.gmra.mrb[2].mxu0 %v1544_v39 }
  0x75   : > { %11682 = vmatpush3.msra.mxu0 %v1469_v38  ;;  %11683 = vmatprep.mubr.f32.mxu0 %v1534_v24 }
  0x76   : > { %12520 = vmatprep.subr.bf16.mxu0 %v13098_v9 }
  0x7c   : > { %11684 = vmatmul.mubr.f32.vlgmr.msra.gmra.mrb[2].mxu0 %v1544_v39 }
  0x7d   : > { %11732 = vmatprep.mubr.msk.f32.mxu0 %vm13099_vm1, %v13100_v58 }
  0x90   : > { %v1965_v4 = vpop.permute.xlu0 %1964 }
  0x91   : > { %vm2015_vm4 = vcmp.eq.s32.totalorder %v13488_v7, %v1965_v4 }
  0x92   : > { %v13496_v10 = vsel %vm2015_vm4, 1.0, %v13100_v58  ;;  %v1979_v52 = vpop.permute.xlu1 %1978  ;;  %vm9587_vm4 = vcmask 1045509  }
  0x93   : > { %v2041_v11 = vsel %vm2039_vm5, %v13496_v10, 0  ;;  %vm2017_vm8 = vcmp.eq.s32.totalorder %v13488_v7, %v1979_v52 }
  0x94   : > { %v1972_v5 = vpop.permute.xlu0 %1971  ;;  %v13504_v37 = vsub.f32 %v2041_v11, %v2041_v11  ;;  %v13587_v53 = vsel %vm2017_vm8, 1.0, %v13100_v58  ;;  %vm9595_vm8 = vcmask 48128  }
  0x95   : > { %vm2016_vm3 = vcmp.eq.s32.totalorder %v13488_v7, %v1972_v5  ;;  %v2969_v61 = vsel %vm2039_vm5, %v13587_v53, 0 }
  0x96   : > { %v13493_v8 = vsel %vm2016_vm3, 1.0, %v13100_v58  ;;  %v13510_v23 = vand.u32 4294901760, %v13504_v37  ;;  %v13603_v30 = vsub.f32 %v2969_v61, %v2969_v61  ;;  %vm9585_vm3 = vcmask 1044484  }
  0x97   : > { %v2507_v57 = vsel %vm2039_vm5, %v13493_v8, 0 }
  0x98   : > { %v13502_v18 = vsub.f32 %v2507_v57, %v2507_v57  ;;  %v2117_v42 = vsub.f32 %v13504_v37, %v13510_v23  ;;  %v13619_v3 = vand.u32 4294901760, %v13603_v30 }
  0x9a   : > { %v13507_v22 = vand.u32 4294901760, %v13502_v18  ;;  %v13525_v13 = vand.u32 4294901760, %v2117_v42  ;;  %v3041_v5 = vsub.f32 %v13603_v30, %v13619_v3 }
  0x9c   : > { %v2579_v32 = vsub.f32 %v13502_v18, %v13507_v22  ;;  %v1986_v12 = vpop.permute.xlu1 %1985  ;;  %v13638_v11 = vand.u32 4294901760, %v3041_v5 }
  0x9d   : > { %vm2018_vm7 = vcmp.eq.s32.totalorder %v13488_v7, %v1986_v12 }
  0x9e   : > { %v13519_v55 = vand.u32 4294901760, %v2579_v32  ;;  %v13582_v29 = vsel %vm2018_vm7, 1.0, %v13100_v58 }
  0x9f   : > { %v3431_v16 = vsel %vm2039_vm5, %v13582_v29, 0 }
  0xa0   : > { %v13601_v62 = vsub.f32 %v3431_v16, %v3431_v16 }
  0xa2   : > { %v13610_v2 = vand.u32 4294901760, %v13601_v62 }
  0xa4   : > { %v3503_v4 = vsub.f32 %v13601_v62, %v13610_v2 }
  0xa6   : > { %v13631_v57 = vand.u32 4294901760, %v3503_v4 }
 0x121   : > { %v11655_v26 = vpop.f32.mrb[0].mxu1 }
 0x122   : > { %v2045_v27 = vsel %vm2043_vm6, %v11655_v26, 0  ;;  %v1450_v28 = vpop.f32.mrb[1].mxu1 }
 0x123   : > { %v2051_v35 = vand.u32 4294901760, %v2045_v27  ;;  %v2048_v36 = vand.u32 4294901760, %v1450_v28  ;;  %v13529_v14 = vpop.f32.mrb[0].mxu0 }
 0x124   : > { %v9417_v21 = vcombine.high %v13529_v14, %v13529_v14  ;;  %v11589_v24 = vpop.f32.mrb[1].mxu0 }
 0x125   : > { %v2133_v48 = vsub.f32 %v2045_v27, %v2051_v35  ;;  %v13517_v50 = vpack.c.bf16 %v2051_v35, %v2048_v36  ;;  %v2126_v54 = vsub.f32 %v1450_v28, %v2048_v36  ;;  %v2000_v24 = vpop.permute.xlu1 %1999 }
 0x126   : > { %v9431_v41 = vrot.slane %v9417_v21, %v13532_v19  ;;  %vm2020_vm9 = vcmp.eq.s32.totalorder %v13488_v7, %v2000_v24 }
 0x127   : > { %v2134_v59 = vand.u32 4294901760, %v2133_v48  ;;  %v2127_v63 = vand.u32 4294901760, %v2126_v54  ;;  %v13521_v0 = vpack.c.bf16 %v2133_v48, %v2126_v54  ;;  %12504 = vmatpush3.bf16.msra.mxu1 %v13517_v50  ;;  %12522 = vmatpush3.bf16.msra.mxu0 %v13517_v50 }
 0x128   : > { %12505 = vmatprep.subr.bf16.mxu1 %v13098_v9  ;;  %12523 = vmatprep.subr.bf16.mxu0 %v13098_v9  ;;  %v9433_v46 = vcombine.high %v9431_v41, %v9431_v41  ;;  %v13548_v47 = vrot.slane %v9431_v41, %v13532_v19 }
 0x129   : > { %v2135_v20 = vsub.f32 %v2133_v48, %v2134_v59  ;;  %v2128_v15 = vsub.f32 %v2126_v54, %v2127_v63  ;;  %v13534_v17 = vpack.c.bf16 %v2134_v59, %v2127_v63 }
 0x12a   : > { %11691 = vmatmul.mubr.f32.vlgmr.msra.gmra.mrb[2].mxu1 %v13525_v13  ;;  %11733 = vmatmul.mubr.f32.vlgmr.msra.gmra.mrb[4].mxu0 %v13519_v55  ;;  %v13553_v60 = vrot.slane %v9433_v46, %v13532_v19 }
 0x12b   : > { %v2136_v38 = vand.u32 4294901760, %v2135_v20  ;;  %v2129_v39 = vand.u32 4294901760, %v2128_v15  ;;  %11697 = vmatprep.mubr.msk.f32.mxu1 %vm13099_vm1, %v13100_v58  ;;  %11739 = vmatprep.mubr.msk.f32.mxu0 %vm13099_vm1, %v13100_v58 }
 0x12d   : > { %v13545_v43 = vpack.c.bf16 %v2136_v38, %v2129_v39  ;;  %v1993_v38 = vpop.permute.xlu0 %1992  ;;  %v13687_v39 = vsel %vm2020_vm9, 1.0, %v13100_v58  ;;  %vm9909_vm9 = vcmask 62496  }
 0x12e   : > { %vm2019_vm10 = vcmp.eq.s32.totalorder %v13488_v7, %v1993_v38  ;;  %v4355_v46 = vsel %vm2039_vm5, %v13687_v39, 0 }
 0x12f   : > { %12507 = vmatpush3.bf16.msra.mxu1 %v13545_v43  ;;  %12525 = vmatpush3.bf16.msra.mxu0 %v13545_v43  ;;  %v13692_v41 = vsel %vm2019_vm10, 1.0, %v13100_v58  ;;  %v13706_v12 = vsub.f32 %v4355_v46, %v4355_v46  ;;  %vm9987_vm10 = vcmask 1043456  }
 0x130   : > { %12508 = vmatprep.subr.bf16.mxu1 %v13098_v9  ;;  %12526 = vmatprep.subr.bf16.mxu0 %v13098_v9  ;;  %v3893_v52 = vsel %vm2039_vm5, %v13692_v41, 0 }
 0x131   : > { %v13708_v16 = vsub.f32 %v3893_v52, %v3893_v52  ;;  %v13715_v61 = vand.u32 4294901760, %v13706_v12 }
 0x132   : > { %11698 = vmatmul.mubr.msk.f32.vlgmr.msra.gmra.mrb[2].mxu1 %vm2039_vm5, %v13496_v10  ;;  %11740 = vmatmul.mubr.msk.f32.vlgmr.msra.gmra.mrb[4].mxu0 %vm2039_vm5, %v13493_v8 }
 0x133   : > { %12510 = vmatpush3.bf16.msra.mxu1 %v13521_v0  ;;  %12528 = vmatpush3.bf16.msra.mxu0 %v13521_v0  ;;  %v13724_v4 = vand.u32 4294901760, %v13708_v16  ;;  %v4427_v5 = vsub.f32 %v13706_v12, %v13715_v61 }
 0x134   : > { %11704 = vmatprep.mubr.msk.f32.mxu1 %vm13099_vm1, %v13100_v58  ;;  %12511 = vmatprep.subr.bf16.mxu1 %v13098_v9 }
 0x135   : > { %11746 = vmatprep.mubr.msk.f32.mxu0 %vm13099_vm1, %v13100_v58  ;;  %12529 = vmatprep.subr.bf16.mxu0 %v13098_v9 }
 0x13a   : > { %11705 = vmatmul.mubr.f32.vlgmr.msra.gmra.mrb[2].mxu1 %v13504_v37  ;;  %11747 = vmatmul.mubr.f32.vlgmr.msra.gmra.mrb[4].mxu0 %v13502_v18 }
 0x13b   : > { %12513 = vmatpush3.bf16.msra.mxu1 %v13517_v50  ;;  %12531 = vmatpush3.bf16.msra.mxu0 %v13517_v50 }
 0x13c   : > { %11711 = vmatprep.mubr.msk.f32.mxu1 %vm13099_vm1, %v13100_v58  ;;  %12514 = vmatprep.subr.bf16.mxu1 %v13098_v9 }
 0x13d   : > { %11753 = vmatprep.mubr.msk.f32.mxu0 %vm13099_vm1, %v13100_v58  ;;  %12532 = vmatprep.subr.bf16.mxu0 %v13098_v9 }
 0x142   : > { %11712 = vmatmul.mubr.f32.vlgmr.msra.gmra.mrb[2].mxu1 %v13510_v23  ;;  %11754 = vmatmul.mubr.f32.vlgmr.msra.gmra.mrb[4].mxu0 %v13507_v22 }
 0x143   : > { %12516 = vmatpush3.bf16.msra.mxu1 %v13534_v17  ;;  %12534 = vmatpush3.bf16.msra.mxu0 %v13534_v17 }
 0x144   : > { %11718 = vmatprep.mubr.msk.f32.mxu1 %vm13099_vm1, %v13100_v58  ;;  %12517 = vmatprep.subr.bf16.mxu1 %v13098_v9 }
 0x145   : > { %11760 = vmatprep.mubr.msk.f32.mxu0 %vm13099_vm1, %v13100_v58  ;;  %12535 = vmatprep.subr.bf16.mxu0 %v13098_v9 }
 0x14a   : > { %11719 = vmatmul.mubr.msk.f32.vlgmr.msra.gmra.mrb[2].mxu1 %vm2039_vm5, %v13496_v10  ;;  %11761 = vmatmul.mubr.msk.f32.vlgmr.msra.gmra.mrb[4].mxu0 %vm2039_vm5, %v13493_v8 }
 0x14b   : > { %12519 = vmatpush3.bf16.msra.mxu1 %v13517_v50  ;;  %12537 = vmatpush3.bf16.msra.mxu0 %v13517_v50 }
 0x14c   : > { %11725 = vmatprep.mubr.msk.f32.mxu1 %vm13099_vm1, %v13100_v58  ;;  %11767 = vmatprep.mubr.msk.f32.mxu0 %vm13099_vm1, %v13100_v58 }
 0x14d   : > { %12538 = vmatprep.subr.bf16.mxu1 %v13098_v9  ;;  %12556 = vmatprep.subr.bf16.mxu0 %v13098_v9 }
 0x14f   : > { %v11685_v26 = vpop.f32.mrb[2].mxu0 }
 0x150   : > { %v5741_v27 = vsel %vm2043_vm6, %v11685_v26, 0  ;;  %v1947_v28 = vpop.f32.mrb[3].mxu0  ;;  %v3965_v26 = vsub.f32 %v13708_v16, %v13724_v4  ;;  %vm9591_vm6 = vcmask 1047559  }
 0x151   : > { %v5747_v32 = vand.u32 4294901760, %v5741_v27  ;;  %v5744_v33 = vand.u32 4294901760, %v1947_v28 }
 0x152   : > { %11726 = vmatmul.mubr.msk.f32.vlgmr.msra.gmra.mrb[2].mxu1 %vm2039_vm5, %v13496_v10  ;;  %11768 = vmatmul.mubr.msk.f32.vlgmr.msra.gmra.mrb[4].mxu0 %vm2039_vm5, %v13493_v8 }
 0x153   : > { %12540 = vmatpush3.bf16.msra.mxu1 %v13517_v50  ;;  %12558 = vmatpush3.bf16.msra.mxu0 %v13517_v50  ;;  %v5829_v34 = vsub.f32 %v5741_v27, %v5747_v32  ;;  %v13651_v35 = vpack.c.bf16 %v5747_v32, %v5744_v33  ;;  %v5822_v36 = vsub.f32 %v1947_v28, %v5744_v33  ;;  %v13736_v27 = vand.u32 4294901760, %v4427_v5  ;;  %v2014_v32 = vpop.permute.xlu1 %2013  ;;  %v2007_v33 = vpop.permute.xlu0 %2006 }
 0x154   : > { %11774 = vmatprep.mubr.msk.f32.mxu1 %vm13099_vm1, %v13100_v58  ;;  %12541 = vmatprep.subr.bf16.mxu1 %v13098_v9  ;;  %v13743_v28 = vand.u32 4294901760, %v3965_v26  ;;  %vm2022_vm11 = vcmp.eq.s32.totalorder %v13488_v7, %v2014_v32  ;;  %vm2021_vm12 = vcmp.eq.s32.totalorder %v13488_v7, %v2007_v33 }
 0x155   : > { %11816 = vmatprep.mubr.msk.f32.mxu0 %vm13099_vm1, %v13100_v58  ;;  %12559 = vmatprep.subr.bf16.mxu0 %v13098_v9  ;;  %v5830_v42 = vand.u32 4294901760, %v5829_v34  ;;  %v5823_v44 = vand.u32 4294901760, %v5822_v36  ;;  %v13656_v48 = vpack.c.bf16 %v5829_v34, %v5822_v36 }
 0x156   : > { %11775 = vmatmul.mubr.f32.vlgmr.msra.gmra.mrb[4].mxu1 %v13638_v11  ;;  %11817 = vmatmul.mubr.f32.vlgmr.msra.gmra.mrb[6].mxu0 %v13631_v57 }
 0x157   : > { %12543 = vmatpush3.bf16.msra.mxu1 %v13545_v43  ;;  %12561 = vmatpush3.bf16.msra.mxu0 %v13545_v43  ;;  %v5831_v54 = vsub.f32 %v5829_v34, %v5830_v42  ;;  %v5824_v59 = vsub.f32 %v5822_v36, %v5823_v44  ;;  %v13658_v63 = vpack.c.bf16 %v5830_v42, %v5823_v44  ;;  %v13783_v34 = vsel %vm2022_vm11, 1.0, %v13100_v58 }
 0x158   : > { %11781 = vmatprep.mubr.msk.f32.mxu1 %vm13099_vm1, %v13100_v58  ;;  %12544 = vmatprep.subr.bf16.mxu1 %v13098_v9  ;;  %v13788_v36 = vsel %vm2021_vm12, 1.0, %v13100_v58  ;;  %v5279_v42 = vsel %vm2039_vm5, %v13783_v34, 0  ;;  %vm9671_vm11 = vcmask 29696   ;;  %vm9984_vm12 = vcmask 31744  }
 0x159   : > { %11823 = vmatprep.mubr.msk.f32.mxu0 %vm13099_vm1, %v13100_v58  ;;  %12562 = vmatprep.subr.bf16.mxu0 %v13098_v9  ;;  %v5832_v20 = vand.u32 4294901760, %v5831_v54  ;;  %v5825_v15 = vand.u32 4294901760, %v5824_v59  ;;  %v4817_v44 = vsel %vm2039_vm5, %v13788_v36, 0  ;;  %v13802_v54 = vsub.f32 %v5279_v42, %v5279_v42 }
 0x15a   : > { %v13804_v59 = vsub.f32 %v4817_v44, %v4817_v44 }
 0x15b   : > { %v13669_v21 = vpack.c.bf16 %v5832_v20, %v5825_v15  ;;  %v13811_v20 = vand.u32 4294901760, %v13802_v54 }
 0x15c   : > { %v13820_v15 = vand.u32 4294901760, %v13804_v59 }
 0x15d   : > { %v5351_v24 = vsub.f32 %v13802_v54, %v13811_v20 }
 0x15e   : > { %11782 = vmatmul.mubr.msk.f32.vlgmr.msra.gmra.mrb[4].mxu1 %vm2039_vm5, %v13587_v53  ;;  %11824 = vmatmul.mubr.msk.f32.vlgmr.msra.gmra.mrb[6].mxu0 %vm2039_vm5, %v13582_v29  ;;  %v4889_v38 = vsub.f32 %v13804_v59, %v13820_v15 }
 0x15f   : > { %12546 = vmatpush3.bf16.msra.mxu1 %v13521_v0  ;;  %12564 = vmatpush3.bf16.msra.mxu0 %v13521_v0  ;;  %v13832_v46 = vand.u32 4294901760, %v5351_v24 }
 0x160   : > { %11788 = vmatprep.mubr.msk.f32.mxu1 %vm13099_vm1, %v13100_v58  ;;  %12547 = vmatprep.subr.bf16.mxu1 %v13098_v9  ;;  %v13839_v52 = vand.u32 4294901760, %v4889_v38 }
 0x161   : > { %11830 = vmatprep.mubr.msk.f32.mxu0 %vm13099_vm1, %v13100_v58  ;;  %12565 = vmatprep.subr.bf16.mxu0 %v13098_v9 }
 0x166   : > { %11789 = vmatmul.mubr.f32.vlgmr.msra.gmra.mrb[4].mxu1 %v13603_v30  ;;  %11831 = vmatmul.mubr.f32.vlgmr.msra.gmra.mrb[6].mxu0 %v13601_v62 }
 0x167   : > { %12549 = vmatpush3.bf16.msra.mxu1 %v13517_v50  ;;  %12567 = vmatpush3.bf16.msra.mxu0 %v13517_v50 }
 0x168   : > { %11795 = vmatprep.mubr.msk.f32.mxu1 %vm13099_vm1, %v13100_v58  ;;  %12550 = vmatprep.subr.bf16.mxu1 %v13098_v9 }
 0x169   : > { %11837 = vmatprep.mubr.msk.f32.mxu0 %vm13099_vm1, %v13100_v58  ;;  %12568 = vmatprep.subr.bf16.mxu0 %v13098_v9 }
 0x16e   : > { %11796 = vmatmul.mubr.f32.vlgmr.msra.gmra.mrb[4].mxu1 %v13619_v3  ;;  %11838 = vmatmul.mubr.f32.vlgmr.msra.gmra.mrb[6].mxu0 %v13610_v2 }
 0x16f   : > { %12552 = vmatpush3.bf16.msra.mxu1 %v13534_v17  ;;  %12570 = vmatpush3.bf16.msra.mxu0 %v13534_v17 }
 0x170   : > { %11802 = vmatprep.mubr.msk.f32.mxu1 %vm13099_vm1, %v13100_v58  ;;  %12553 = vmatprep.subr.bf16.mxu1 %v13098_v9 }
 0x171   : > { %11844 = vmatprep.mubr.msk.f32.mxu0 %vm13099_vm1, %v13100_v58  ;;  %12571 = vmatprep.subr.bf16.mxu0 %v13098_v9 }
 0x176   : > { %11803 = vmatmul.mubr.msk.f32.vlgmr.msra.gmra.mrb[4].mxu1 %vm2039_vm5, %v13587_v53  ;;  %11845 = vmatmul.mubr.msk.f32.vlgmr.msra.gmra.mrb[6].mxu0 %vm2039_vm5, %v13582_v29 }
 0x177   : > { %12555 = vmatpush3.bf16.msra.mxu1 %v13517_v50  ;;  %12573 = vmatpush3.bf16.msra.mxu0 %v13517_v50 }
 0x178   : > { %11809 = vmatprep.mubr.msk.f32.mxu1 %vm13099_vm1, %v13100_v58  ;;  %11851 = vmatprep.mubr.msk.f32.mxu0 %vm13099_vm1, %v13100_v58 }
 0x179   : > { %12574 = vmatprep.subr.bf16.mxu1 %v13098_v9  ;;  %12592 = vmatprep.subr.bf16.mxu0 %v13098_v9 }
 0x17e   : > { %11810 = vmatmul.mubr.msk.f32.vlgmr.msra.gmra.mrb[4].mxu1 %vm2039_vm5, %v13587_v53  ;;  %11852 = vmatmul.mubr.msk.f32.vlgmr.msra.gmra.mrb[6].mxu0 %vm2039_vm5, %v13582_v29 }
 0x17f   : > { %12576 = vmatpush3.bf16.msra.mxu1 %v13517_v50  ;;  %12594 = vmatpush3.bf16.msra.mxu0 %v13517_v50 }
 0x180   : > { %11858 = vmatprep.mubr.msk.f32.mxu1 %vm13099_vm1, %v13100_v58  ;;  %12577 = vmatprep.subr.bf16.mxu1 %v13098_v9 }
 0x181   : > { %11900 = vmatprep.mubr.msk.f32.mxu0 %vm13099_vm1, %v13100_v58  ;;  %12595 = vmatprep.subr.bf16.mxu0 %v13098_v9 }
 0x182   : > { %11859 = vmatmul.mubr.f32.vlgmr.msra.gmra.mrb[6].mxu1 %v13743_v28  ;;  %11901 = vmatmul.mubr.f32.vlgmr.msra.gmra.mrb[8].mxu0 %v13736_v27 }
 0x183   : > { %12579 = vmatpush3.bf16.msra.mxu1 %v13545_v43  ;;  %12597 = vmatpush3.bf16.msra.mxu0 %v13545_v43 }
 0x184   : > { %11865 = vmatprep.mubr.msk.f32.mxu1 %vm13099_vm1, %v13100_v58  ;;  %12580 = vmatprep.subr.bf16.mxu1 %v13098_v9 }
 0x185   : > { %11907 = vmatprep.mubr.msk.f32.mxu0 %vm13099_vm1, %v13100_v58  ;;  %12598 = vmatprep.subr.bf16.mxu0 %v13098_v9 }
 0x18a   : > { %11866 = vmatmul.mubr.msk.f32.vlgmr.msra.gmra.mrb[6].mxu1 %vm2039_vm5, %v13692_v41  ;;  %11908 = vmatmul.mubr.msk.f32.vlgmr.msra.gmra.mrb[8].mxu0 %vm2039_vm5, %v13687_v39 }
 0x18b   : > { %12582 = vmatpush3.bf16.msra.mxu1 %v13521_v0  ;;  %12600 = vmatpush3.bf16.msra.mxu0 %v13521_v0 }
 0x18c   : > { %11872 = vmatprep.mubr.msk.f32.mxu1 %vm13099_vm1, %v13100_v58  ;;  %12583 = vmatprep.subr.bf16.mxu1 %v13098_v9 }
 0x18d   : > { %11914 = vmatprep.mubr.msk.f32.mxu0 %vm13099_vm1, %v13100_v58  ;;  %12601 = vmatprep.subr.bf16.mxu0 %v13098_v9 }
 0x192   : > { %11873 = vmatmul.mubr.f32.vlgmr.msra.gmra.mrb[6].mxu1 %v13708_v16  ;;  %11915 = vmatmul.mubr.f32.vlgmr.msra.gmra.mrb[8].mxu0 %v13706_v12 }
 0x193   : > { %12585 = vmatpush3.bf16.msra.mxu1 %v13517_v50  ;;  %12603 = vmatpush3.bf16.msra.mxu0 %v13517_v50 }
 0x194   : > { %11879 = vmatprep.mubr.msk.f32.mxu1 %vm13099_vm1, %v13100_v58  ;;  %12586 = vmatprep.subr.bf16.mxu1 %v13098_v9 }
 0x195   : > { %11921 = vmatprep.mubr.msk.f32.mxu0 %vm13099_vm1, %v13100_v58  ;;  %12604 = vmatprep.subr.bf16.mxu0 %v13098_v9 }
 0x19a   : > { %11880 = vmatmul.mubr.f32.vlgmr.msra.gmra.mrb[6].mxu1 %v13724_v4  ;;  %11922 = vmatmul.mubr.f32.vlgmr.msra.gmra.mrb[8].mxu0 %v13715_v61 }
 0x19b   : > { %12588 = vmatpush3.bf16.msra.mxu1 %v13534_v17  ;;  %12606 = vmatpush3.bf16.msra.mxu0 %v13534_v17 }
 0x19c   : > { %11886 = vmatprep.mubr.msk.f32.mxu1 %vm13099_vm1, %v13100_v58  ;;  %12589 = vmatprep.subr.bf16.mxu1 %v13098_v9 }
 0x19d   : > { %11928 = vmatprep.mubr.msk.f32.mxu0 %vm13099_vm1, %v13100_v58  ;;  %12607 = vmatprep.subr.bf16.mxu0 %v13098_v9 }
 0x1a2   : > { %11887 = vmatmul.mubr.msk.f32.vlgmr.msra.gmra.mrb[6].mxu1 %vm2039_vm5, %v13692_v41  ;;  %11929 = vmatmul.mubr.msk.f32.vlgmr.msra.gmra.mrb[8].mxu0 %vm2039_vm5, %v13687_v39 }
 0x1a3   : > { %12591 = vmatpush3.bf16.msra.mxu1 %v13517_v50  ;;  %12609 = vmatpush3.bf16.msra.mxu0 %v13517_v50 }
 0x1a4   : > { %11893 = vmatprep.mubr.msk.f32.mxu1 %vm13099_vm1, %v13100_v58  ;;  %11935 = vmatprep.mubr.msk.f32.mxu0 %vm13099_vm1, %v13100_v58 }
 0x1a5   : > { %12610 = vmatprep.subr.bf16.mxu1 %v13098_v9  ;;  %12628 = vmatprep.subr.bf16.mxu0 %v13098_v9 }
 0x1aa   : > { %11894 = vmatmul.mubr.msk.f32.vlgmr.msra.gmra.mrb[6].mxu1 %vm2039_vm5, %v13692_v41  ;;  %11936 = vmatmul.mubr.msk.f32.vlgmr.msra.gmra.mrb[8].mxu0 %vm2039_vm5, %v13687_v39 }
 0x1ab   : > { %12612 = vmatpush3.bf16.msra.mxu1 %v13517_v50  ;;  %12630 = vmatpush3.bf16.msra.mxu0 %v13517_v50 }
 0x1ac   : > { %11942 = vmatprep.mubr.msk.f32.mxu1 %vm13099_vm1, %v13100_v58  ;;  %12613 = vmatprep.subr.bf16.mxu1 %v13098_v9 }
 0x1ad   : > { %11984 = vmatprep.mubr.msk.f32.mxu0 %vm13099_vm1, %v13100_v58  ;;  %12631 = vmatprep.subr.bf16.mxu0 %v13098_v9 }
 0x1ae   : > { %11943 = vmatmul.mubr.f32.vlgmr.msra.gmra.mrb[8].mxu1 %v13839_v52  ;;  %11985 = vmatmul.mubr.f32.vlgmr.msra.gmra.mrb[10].mxu0 %v13832_v46 }
 0x1af   : > { %12615 = vmatpush3.bf16.msra.mxu1 %v13545_v43  ;;  %12633 = vmatpush3.bf16.msra.mxu0 %v13545_v43 }
 0x1b0   : > { %11949 = vmatprep.mubr.msk.f32.mxu1 %vm13099_vm1, %v13100_v58  ;;  %12616 = vmatprep.subr.bf16.mxu1 %v13098_v9 }
 0x1b1   : > { %11991 = vmatprep.mubr.msk.f32.mxu0 %vm13099_vm1, %v13100_v58  ;;  %12634 = vmatprep.subr.bf16.mxu0 %v13098_v9 }
 0x1b6   : > { %11950 = vmatmul.mubr.msk.f32.vlgmr.msra.gmra.mrb[8].mxu1 %vm2039_vm5, %v13788_v36  ;;  %11992 = vmatmul.mubr.msk.f32.vlgmr.msra.gmra.mrb[10].mxu0 %vm2039_vm5, %v13783_v34 }
 0x1b7   : > { %12618 = vmatpush3.bf16.msra.mxu1 %v13521_v0  ;;  %12636 = vmatpush3.bf16.msra.mxu0 %v13521_v0 }
 0x1b8   : > { %11956 = vmatprep.mubr.msk.f32.mxu1 %vm13099_vm1, %v13100_v58  ;;  %12619 = vmatprep.subr.bf16.mxu1 %v13098_v9 }
 0x1b9   : > { %11998 = vmatprep.mubr.msk.f32.mxu0 %vm13099_vm1, %v13100_v58  ;;  %12637 = vmatprep.subr.bf16.mxu0 %v13098_v9 }
 0x1be   : > { %11957 = vmatmul.mubr.f32.vlgmr.msra.gmra.mrb[8].mxu1 %v13804_v59  ;;  %11999 = vmatmul.mubr.f32.vlgmr.msra.gmra.mrb[10].mxu0 %v13802_v54 }
 0x1bf   : > { %12621 = vmatpush3.bf16.msra.mxu1 %v13517_v50  ;;  %12639 = vmatpush3.bf16.msra.mxu0 %v13517_v50 }
 0x1c0   : > { %11963 = vmatprep.mubr.msk.f32.mxu1 %vm13099_vm1, %v13100_v58  ;;  %12622 = vmatprep.subr.bf16.mxu1 %v13098_v9 }
 0x1c1   : > { %12005 = vmatprep.mubr.msk.f32.mxu0 %vm13099_vm1, %v13100_v58  ;;  %12640 = vmatprep.subr.bf16.mxu0 %v13098_v9 }
 0x1c6   : > { %11964 = vmatmul.mubr.f32.vlgmr.msra.gmra.mrb[8].mxu1 %v13820_v15  ;;  %12006 = vmatmul.mubr.f32.vlgmr.msra.gmra.mrb[10].mxu0 %v13811_v20 }
 0x1c7   : > { %12624 = vmatpush3.bf16.msra.mxu1 %v13534_v17  ;;  %12642 = vmatpush3.bf16.msra.mxu0 %v13534_v17 }
 0x1c8   : > { %11970 = vmatprep.mubr.msk.f32.mxu1 %vm13099_vm1, %v13100_v58  ;;  %12625 = vmatprep.subr.bf16.mxu1 %v13098_v9 }
 0x1c9   : > { %12012 = vmatprep.mubr.msk.f32.mxu0 %vm13099_vm1, %v13100_v58  ;;  %12643 = vmatprep.subr.bf16.mxu0 %v13098_v9 }
 0x1ce   : > { %11971 = vmatmul.mubr.msk.f32.vlgmr.msra.gmra.mrb[8].mxu1 %vm2039_vm5, %v13788_v36  ;;  %12013 = vmatmul.mubr.msk.f32.vlgmr.msra.gmra.mrb[10].mxu0 %vm2039_vm5, %v13783_v34 }
 0x1cf   : > { %12627 = vmatpush3.bf16.msra.mxu1 %v13517_v50  ;;  %12645 = vmatpush3.bf16.msra.mxu0 %v13517_v50 }
 0x1d0   : > { %11977 = vmatprep.mubr.msk.f32.mxu1 %vm13099_vm1, %v13100_v58  ;;  %12019 = vmatprep.mubr.msk.f32.mxu0 %vm13099_vm1, %v13100_v58 }
 0x1d1   : > { %12646 = vmatprep.subr.bf16.mxu1 %v13098_v9  ;;  %12664 = vmatprep.subr.bf16.mxu0 %v13098_v9 }
 0x1d6   : > { %11978 = vmatmul.mubr.msk.f32.vlgmr.msra.gmra.mrb[8].mxu1 %vm2039_vm5, %v13788_v36  ;;  %12020 = vmatmul.mubr.msk.f32.vlgmr.msra.gmra.mrb[10].mxu0 %vm2039_vm5, %v13783_v34 }
 0x1d7   : > { %12648 = vmatpush3.bf16.msra.mxu1 %v13651_v35  ;;  %12666 = vmatpush3.bf16.msra.mxu0 %v13651_v35 }
 0x1d8   : > { %12026 = vmatprep.mubr.msk.f32.mxu1 %vm13099_vm1, %v13100_v58  ;;  %12068 = vmatprep.mubr.msk.f32.mxu0 %vm13099_vm1, %v13100_v58 }
 0x1d9   : > { %12649 = vmatprep.subr.bf16.mxu1 %v13098_v9  ;;  %12667 = vmatprep.subr.bf16.mxu0 %v13098_v9 }
 0x1da   : > { %12027 = vmatmul.mubr.f32.vlgmr.msra.gmra.mrb[10].mxu1 %v13525_v13  ;;  %12069 = vmatmul.mubr.f32.vlgmr.msra.gmra.mrb[12].mxu0 %v13519_v55 }
 0x1db   : > { %12651 = vmatpush3.bf16.msra.mxu1 %v13669_v21  ;;  %12669 = vmatpush3.bf16.msra.mxu0 %v13669_v21 }
 0x1dc   : > { %12033 = vmatprep.mubr.msk.f32.mxu1 %vm13099_vm1, %v13100_v58  ;;  %12652 = vmatprep.subr.bf16.mxu1 %v13098_v9 }
 0x1dd   : > { %12075 = vmatprep.mubr.msk.f32.mxu0 %vm13099_vm1, %v13100_v58  ;;  %12670 = vmatprep.subr.bf16.mxu0 %v13098_v9 }
 0x1e2   : > { %12034 = vmatmul.mubr.msk.f32.vlgmr.msra.gmra.mrb[10].mxu1 %vm2039_vm5, %v13496_v10  ;;  %12076 = vmatmul.mubr.msk.f32.vlgmr.msra.gmra.mrb[12].mxu0 %vm2039_vm5, %v13493_v8 }
 0x1e3   : > { %12654 = vmatpush3.bf16.msra.mxu1 %v13656_v48  ;;  %12672 = vmatpush3.bf16.msra.mxu0 %v13656_v48 }
 0x1e4   : > { %12040 = vmatprep.mubr.msk.f32.mxu1 %vm13099_vm1, %v13100_v58  ;;  %12655 = vmatprep.subr.bf16.mxu1 %v13098_v9 }
 0x1e5   : > { %12082 = vmatprep.mubr.msk.f32.mxu0 %vm13099_vm1, %v13100_v58  ;;  %12673 = vmatprep.subr.bf16.mxu0 %v13098_v9 }
 0x1ea   : > { %12041 = vmatmul.mubr.f32.vlgmr.msra.gmra.mrb[10].mxu1 %v13504_v37  ;;  %12083 = vmatmul.mubr.f32.vlgmr.msra.gmra.mrb[12].mxu0 %v13502_v18 }
 0x1eb   : > { %12657 = vmatpush3.bf16.msra.mxu1 %v13651_v35  ;;  %12675 = vmatpush3.bf16.msra.mxu0 %v13651_v35 }
 0x1ec   : > { %12047 = vmatprep.mubr.msk.f32.mxu1 %vm13099_vm1, %v13100_v58  ;;  %12658 = vmatprep.subr.bf16.mxu1 %v13098_v9 }
 0x1ed   : > { %12089 = vmatprep.mubr.msk.f32.mxu0 %vm13099_vm1, %v13100_v58  ;;  %12676 = vmatprep.subr.bf16.mxu0 %v13098_v9 }
 0x1f2   : > { %12048 = vmatmul.mubr.f32.vlgmr.msra.gmra.mrb[10].mxu1 %v13510_v23  ;;  %12090 = vmatmul.mubr.f32.vlgmr.msra.gmra.mrb[12].mxu0 %v13507_v22 }
 0x1f3   : > { %12660 = vmatpush3.bf16.msra.mxu1 %v13658_v63  ;;  %12678 = vmatpush3.bf16.msra.mxu0 %v13658_v63 }
 0x1f4   : > { %12054 = vmatprep.mubr.msk.f32.mxu1 %vm13099_vm1, %v13100_v58  ;;  %12661 = vmatprep.subr.bf16.mxu1 %v13098_v9 }
 0x1f5   : > { %12096 = vmatprep.mubr.msk.f32.mxu0 %vm13099_vm1, %v13100_v58  ;;  %12679 = vmatprep.subr.bf16.mxu0 %v13098_v9 }
 0x1fa   : > { %12055 = vmatmul.mubr.msk.f32.vlgmr.msra.gmra.mrb[10].mxu1 %vm2039_vm5, %v13496_v10  ;;  %12097 = vmatmul.mubr.msk.f32.vlgmr.msra.gmra.mrb[12].mxu0 %vm2039_vm5, %v13493_v8 }
 0x1fb   : > { %12663 = vmatpush3.bf16.msra.mxu1 %v13651_v35  ;;  %12681 = vmatpush3.bf16.msra.mxu0 %v13651_v35 }
 0x1fc   : > { %12061 = vmatprep.mubr.msk.f32.mxu1 %vm13099_vm1, %v13100_v58  ;;  %12103 = vmatprep.mubr.msk.f32.mxu0 %vm13099_vm1, %v13100_v58 }
 0x1fd   : > { %12682 = vmatprep.subr.bf16.mxu1 %v13098_v9  ;;  %12700 = vmatprep.subr.bf16.mxu0 %v13098_v9 }
 0x202   : > { %12062 = vmatmul.mubr.msk.f32.vlgmr.msra.gmra.mrb[10].mxu1 %vm2039_vm5, %v13496_v10  ;;  %12104 = vmatmul.mubr.msk.f32.vlgmr.msra.gmra.mrb[12].mxu0 %vm2039_vm5, %v13493_v8  ;;  %v9424_v8 = vrot.slane %v13529_v14, %v13532_v19 }
 0x203   : > { %12684 = vmatpush3.bf16.msra.mxu1 %v13651_v35  ;;  %12702 = vmatpush3.bf16.msra.mxu0 %v13651_v35 }
 0x204   : > { %12110 = vmatprep.mubr.msk.f32.mxu1 %vm13099_vm1, %v13100_v58  ;;  %12685 = vmatprep.subr.bf16.mxu1 %v13098_v9  ;;  %v9432_v10 = vcombine.high %v9424_v8, %v9424_v8  ;;  %v14015_v18 = vrot.slane %v9424_v8, %v13532_v19 }
 0x205   : > { %12152 = vmatprep.mubr.msk.f32.mxu0 %vm13099_vm1, %v13100_v58  ;;  %12703 = vmatprep.subr.bf16.mxu0 %v13098_v9 }
 0x206   : > { %12111 = vmatmul.mubr.f32.vlgmr.msra.gmra.mrb[12].mxu1 %v13638_v11  ;;  %12153 = vmatmul.mubr.f32.vlgmr.msra.gmra.mrb[14].mxu0 %v13631_v57  ;;  %v14018_v37 = vrot.slane %v9432_v10, %v13532_v19  ;;  %v9469_v22 = vrot.slane %v14015_v18, %v13336_v1  ;;  %v9462_v17 = vcombine.high %v14015_v18, %v14015_v18 }
 0x207   : > { %12687 = vmatpush3.bf16.msra.mxu1 %v13669_v21  ;;  %12705 = vmatpush3.bf16.msra.mxu0 %v13669_v21 }
 0x208   : > { %12117 = vmatprep.mubr.msk.f32.mxu1 %vm13099_vm1, %v13100_v58  ;;  %12688 = vmatprep.subr.bf16.mxu1 %v13098_v9  ;;  %v9473_v23 = vrot.slane %v14018_v37, %v13336_v1  ;;  %v9464_v43 = vcombine.high %v14018_v37, %v14018_v37 }
 0x209   : > { %12159 = vmatprep.mubr.msk.f32.mxu0 %vm13099_vm1, %v13100_v58  ;;  %12706 = vmatprep.subr.bf16.mxu0 %v13098_v9 }
 0x20e   : > { %12118 = vmatmul.mubr.msk.f32.vlgmr.msra.gmra.mrb[12].mxu1 %vm2039_vm5, %v13587_v53  ;;  %12160 = vmatmul.mubr.msk.f32.vlgmr.msra.gmra.mrb[14].mxu0 %vm2039_vm5, %v13582_v29 }
 0x20f   : > { %12690 = vmatpush3.bf16.msra.mxu1 %v13656_v48  ;;  %12708 = vmatpush3.bf16.msra.mxu0 %v13656_v48 }
 0x210   : > { %12124 = vmatprep.mubr.msk.f32.mxu1 %vm13099_vm1, %v13100_v58  ;;  %12691 = vmatprep.subr.bf16.mxu1 %v13098_v9 }
 0x211   : > { %12166 = vmatprep.mubr.msk.f32.mxu0 %vm13099_vm1, %v13100_v58  ;;  %12709 = vmatprep.subr.bf16.mxu0 %v13098_v9 }
 0x216   : > { %12125 = vmatmul.mubr.f32.vlgmr.msra.gmra.mrb[12].mxu1 %v13603_v30  ;;  %12167 = vmatmul.mubr.f32.vlgmr.msra.gmra.mrb[14].mxu0 %v13601_v62 }
 0x217   : > { %12693 = vmatpush3.bf16.msra.mxu1 %v13651_v35  ;;  %12711 = vmatpush3.bf16.msra.mxu0 %v13651_v35 }
 0x218   : > { %12131 = vmatprep.mubr.msk.f32.mxu1 %vm13099_vm1, %v13100_v58  ;;  %12694 = vmatprep.subr.bf16.mxu1 %v13098_v9 }
 0x219   : > { %12173 = vmatprep.mubr.msk.f32.mxu0 %vm13099_vm1, %v13100_v58  ;;  %12712 = vmatprep.subr.bf16.mxu0 %v13098_v9 }
 0x21e   : > { %12132 = vmatmul.mubr.f32.vlgmr.msra.gmra.mrb[12].mxu1 %v13619_v3  ;;  %12174 = vmatmul.mubr.f32.vlgmr.msra.gmra.mrb[14].mxu0 %v13610_v2 }
 0x21f   : > { %12696 = vmatpush3.bf16.msra.mxu1 %v13658_v63  ;;  %12714 = vmatpush3.bf16.msra.mxu0 %v13658_v63 }
 0x220   : > { %12138 = vmatprep.mubr.msk.f32.mxu1 %vm13099_vm1, %v13100_v58  ;;  %12697 = vmatprep.subr.bf16.mxu1 %v13098_v9 }
 0x221   : > { %12180 = vmatprep.mubr.msk.f32.mxu0 %vm13099_vm1, %v13100_v58  ;;  %12715 = vmatprep.subr.bf16.mxu0 %v13098_v9 }
 0x225   : > { %v2502_v50 = vpop.f32.mrb[2].mxu1  ;;  %v2964_v55 = vpop.f32.mrb[4].mxu0 }
 0x226   : > { %v14030_v0 = vmul.f32 %v9469_v22, %v2502_v50  ;;  %v14032_v13 = vmul.f32 %v9473_v23, %v2964_v55  ;;  %v11727_v14 = vpop.f32.mrb[3].mxu1  ;;  %v11769_v19 = vpop.f32.mrb[5].mxu0  ;;  %12139 = vmatmul.mubr.msk.f32.vlgmr.msra.gmra.mrb[12].mxu1 %vm2039_vm5, %v13587_v53  ;;  %12181 = vmatmul.mubr.msk.f32.vlgmr.msra.gmra.mrb[14].mxu0 %vm2039_vm5, %v13582_v29 }
 0x227   : > { %12699 = vmatpush3.bf16.msra.mxu1 %v13651_v35  ;;  %12717 = vmatpush3.bf16.msra.mxu0 %v13651_v35 }
 0x228   : > { %9737 = vrot.lane.b32.xlu0 %v14030_v0, %s13102_s28  ;;  %9739 = vrot.lane.b32.xlu1 %v14032_v13, %s13102_s28 }
 0x229   : > { %12145 = vmatprep.mubr.msk.f32.mxu1 %vm13099_vm1, %v13100_v58  ;;  %12187 = vmatprep.mubr.msk.f32.mxu0 %vm13099_vm1, %v13100_v58 }
 0x22a   : > { %12718 = vmatprep.subr.bf16.mxu1 %v13098_v9  ;;  %12736 = vmatprep.subr.bf16.mxu0 %v13098_v9 }
 0x22e   : > { %12146 = vmatmul.mubr.msk.f32.vlgmr.msra.gmra.mrb[12].mxu1 %vm2039_vm5, %v13587_v53  ;;  %12188 = vmatmul.mubr.msk.f32.vlgmr.msra.gmra.mrb[14].mxu0 %vm2039_vm5, %v13582_v29  ;;  %v9477_v29 = vrot.slane %v9462_v17, %v13336_v1  ;;  %v9481_v53 = vrot.slane %v9464_v43, %v13336_v1  ;;  %v9515_v43 = vsel %vm9514_vm13, %v14030_v0, 0.0 }
 0x22f   : > { %12720 = vmatpush3.bf16.msra.mxu1 %v13651_v35  ;;  %12738 = vmatpush3.bf16.msra.mxu0 %v13651_v35 }
 0x230   : > { %12194 = vmatprep.mubr.msk.f32.mxu1 %vm13099_vm1, %v13100_v58  ;;  %12721 = vmatprep.subr.bf16.mxu1 %v13098_v9 }
 0x231   : > { %12236 = vmatprep.mubr.msk.f32.mxu0 %vm13099_vm1, %v13100_v58  ;;  %12739 = vmatprep.subr.bf16.mxu0 %v13098_v9 }
 0x232   : > { %12195 = vmatmul.mubr.f32.vlgmr.msra.gmra.mrb[14].mxu1 %v13743_v28  ;;  %12237 = vmatmul.mubr.f32.vlgmr.msra.gmra.mrb[16].mxu0 %v13736_v27 }
 0x233   : > { %12723 = vmatpush3.bf16.msra.mxu1 %v13669_v21  ;;  %12741 = vmatpush3.bf16.msra.mxu0 %v13669_v21 }
 0x234   : > { %12201 = vmatprep.mubr.msk.f32.mxu1 %vm13099_vm1, %v13100_v58  ;;  %12724 = vmatprep.subr.bf16.mxu1 %v13098_v9 }
 0x235   : > { %12243 = vmatprep.mubr.msk.f32.mxu0 %vm13099_vm1, %v13100_v58  ;;  %12742 = vmatprep.subr.bf16.mxu0 %v13098_v9 }
 0x23a   : > { %12202 = vmatmul.mubr.msk.f32.vlgmr.msra.gmra.mrb[14].mxu1 %vm2039_vm5, %v13692_v41  ;;  %12244 = vmatmul.mubr.msk.f32.vlgmr.msra.gmra.mrb[16].mxu0 %vm2039_vm5, %v13687_v39 }
 0x23b   : > { %12726 = vmatpush3.bf16.msra.mxu1 %v13656_v48  ;;  %12744 = vmatpush3.bf16.msra.mxu0 %v13656_v48 }
 0x23c   : > { %12208 = vmatprep.mubr.msk.f32.mxu1 %vm13099_vm1, %v13100_v58  ;;  %12727 = vmatprep.subr.bf16.mxu1 %v13098_v9 }
 0x23d   : > { %12250 = vmatprep.mubr.msk.f32.mxu0 %vm13099_vm1, %v13100_v58  ;;  %12745 = vmatprep.subr.bf16.mxu0 %v13098_v9 }
 0x242   : > { %12209 = vmatmul.mubr.f32.vlgmr.msra.gmra.mrb[14].mxu1 %v13708_v16  ;;  %12251 = vmatmul.mubr.f32.vlgmr.msra.gmra.mrb[16].mxu0 %v13706_v12 }
 0x243   : > { %12729 = vmatpush3.bf16.msra.mxu1 %v13651_v35  ;;  %12747 = vmatpush3.bf16.msra.mxu0 %v13651_v35 }
 0x244   : > { %12215 = vmatprep.mubr.msk.f32.mxu1 %vm13099_vm1, %v13100_v58  ;;  %12730 = vmatprep.subr.bf16.mxu1 %v13098_v9 }
 0x245   : > { %12257 = vmatprep.mubr.msk.f32.mxu0 %vm13099_vm1, %v13100_v58  ;;  %12748 = vmatprep.subr.bf16.mxu0 %v13098_v9 }
 0x24a   : > { %12216 = vmatmul.mubr.f32.vlgmr.msra.gmra.mrb[14].mxu1 %v13724_v4  ;;  %12258 = vmatmul.mubr.f32.vlgmr.msra.gmra.mrb[16].mxu0 %v13715_v61 }
 0x24b   : > { %12732 = vmatpush3.bf16.msra.mxu1 %v13658_v63  ;;  %12750 = vmatpush3.bf16.msra.mxu0 %v13658_v63 }
 0x24c   : > { %12222 = vmatprep.mubr.msk.f32.mxu1 %vm13099_vm1, %v13100_v58  ;;  %12733 = vmatprep.subr.bf16.mxu1 %v13098_v9 }
 0x24d   : > { %12264 = vmatprep.mubr.msk.f32.mxu0 %vm13099_vm1, %v13100_v58  ;;  %12751 = vmatprep.subr.bf16.mxu0 %v13098_v9 }
 0x251   : > { %v3426_v62 = vpop.f32.mrb[4].mxu1  ;;  %v3888_v30 = vpop.f32.mrb[6].mxu0 }
 0x252   : > { %v14110_v2 = vmul.f32 %v9477_v29, %v3426_v62  ;;  %v14112_v3 = vmul.f32 %v9481_v53, %v3888_v30  ;;  %v11811_v57 = vpop.f32.mrb[5].mxu1  ;;  %v11853_v11 = vpop.f32.mrb[7].mxu0  ;;  %12223 = vmatmul.mubr.msk.f32.vlgmr.msra.gmra.mrb[14].mxu1 %vm2039_vm5, %v13692_v41  ;;  %12265 = vmatmul.mubr.msk.f32.vlgmr.msra.gmra.mrb[16].mxu0 %vm2039_vm5, %v13687_v39  ;;  %v9518_v29 = vsel %vm9514_vm13, %v14032_v13, 0.0 }
 0x253   : > { %12735 = vmatpush3.bf16.msra.mxu1 %v13651_v35  ;;  %12753 = vmatpush3.bf16.msra.mxu0 %v13651_v35 }
 0x254   : > { %9741 = vrot.lane.b32.xlu0 %v14110_v2, %s13102_s28  ;;  %9743 = vrot.lane.b32.xlu1 %v14112_v3, %s13102_s28  ;;  %v9521_v53 = vsel %vm9514_vm13, %v14110_v2, 0.0  ;;  %v9524_v62 = vsel %vm9514_vm13, %v14112_v3, 0.0 }
 0x255   : > { %12229 = vmatprep.mubr.msk.f32.mxu1 %vm13099_vm1, %v13100_v58  ;;  %12271 = vmatprep.mubr.msk.f32.mxu0 %vm13099_vm1, %v13100_v58 }
 0x256   : > { %12754 = vmatprep.subr.bf16.mxu1 %v13098_v9  ;;  %12772 = vmatprep.subr.bf16.mxu0 %v13098_v9 }
 0x25a   : > { %12230 = vmatmul.mubr.msk.f32.vlgmr.msra.gmra.mrb[14].mxu1 %vm2039_vm5, %v13692_v41  ;;  %12272 = vmatmul.mubr.msk.f32.vlgmr.msra.gmra.mrb[16].mxu0 %vm2039_vm5, %v13687_v39 }
 0x25b   : > { %12756 = vmatpush3.bf16.msra.mxu1 %v13651_v35  ;;  %12774 = vmatpush3.bf16.msra.mxu0 %v13651_v35 }
 0x25c   : > { %12278 = vmatprep.mubr.msk.f32.mxu1 %vm13099_vm1, %v13100_v58  ;;  %12757 = vmatprep.subr.bf16.mxu1 %v13098_v9 }
 0x25d   : > { %12320 = vmatprep.mubr.msk.f32.mxu0 %vm13099_vm1, %v13100_v58  ;;  %12775 = vmatprep.subr.bf16.mxu0 %v13098_v9 }
 0x25e   : > { %12279 = vmatmul.mubr.f32.vlgmr.msra.gmra.mrb[16].mxu1 %v13839_v52  ;;  %12321 = vmatmul.mubr.f32.vlgmr.msra.gmra.mrb[18].mxu0 %v13832_v46 }
 0x25f   : > { %12759 = vmatpush3.bf16.msra.mxu1 %v13669_v21  ;;  %12777 = vmatpush3.bf16.msra.mxu0 %v13669_v21  ;;  %v9489_v21 = vrot.slane %v13553_v60, %v13336_v1 }
 0x260   : > { %12285 = vmatprep.mubr.msk.f32.mxu1 %vm13099_vm1, %v13100_v58  ;;  %12760 = vmatprep.subr.bf16.mxu1 %v13098_v9 }
 0x261   : > { %12327 = vmatprep.mubr.msk.f32.mxu0 %vm13099_vm1, %v13100_v58  ;;  %12778 = vmatprep.subr.bf16.mxu0 %v13098_v9 }
 0x266   : > { %12286 = vmatmul.mubr.msk.f32.vlgmr.msra.gmra.mrb[16].mxu1 %vm2039_vm5, %v13788_v36  ;;  %12328 = vmatmul.mubr.msk.f32.vlgmr.msra.gmra.mrb[18].mxu0 %vm2039_vm5, %v13783_v34 }
 0x267   : > { %12762 = vmatpush3.bf16.msra.mxu1 %v13656_v48  ;;  %12780 = vmatpush3.bf16.msra.mxu0 %v13656_v48  ;;  %v9485_v48 = vrot.slane %v13548_v47, %v13336_v1 }
 0x268   : > { %12292 = vmatprep.mubr.msk.f32.mxu1 %vm13099_vm1, %v13100_v58  ;;  %12763 = vmatprep.subr.bf16.mxu1 %v13098_v9 }
 0x269   : > { %12334 = vmatprep.mubr.msk.f32.mxu0 %vm13099_vm1, %v13100_v58  ;;  %12781 = vmatprep.subr.bf16.mxu0 %v13098_v9 }
 0x26e   : > { %12293 = vmatmul.mubr.f32.vlgmr.msra.gmra.mrb[16].mxu1 %v13804_v59  ;;  %12335 = vmatmul.mubr.f32.vlgmr.msra.gmra.mrb[18].mxu0 %v13802_v54 }
 0x26f   : > { %12765 = vmatpush3.bf16.msra.mxu1 %v13651_v35  ;;  %12783 = vmatpush3.bf16.msra.mxu0 %v13651_v35 }
 0x270   : > { %12299 = vmatprep.mubr.msk.f32.mxu1 %vm13099_vm1, %v13100_v58  ;;  %12766 = vmatprep.subr.bf16.mxu1 %v13098_v9 }
 0x271   : > { %12341 = vmatprep.mubr.msk.f32.mxu0 %vm13099_vm1, %v13100_v58  ;;  %12784 = vmatprep.subr.bf16.mxu0 %v13098_v9 }
 0x276   : > { %12300 = vmatmul.mubr.f32.vlgmr.msra.gmra.mrb[16].mxu1 %v13820_v15  ;;  %12342 = vmatmul.mubr.f32.vlgmr.msra.gmra.mrb[18].mxu0 %v13811_v20 }
 0x277   : > { %12768 = vmatpush3.bf16.msra.mxu1 %v13658_v63  ;;  %12786 = vmatpush3.bf16.msra.mxu0 %v13658_v63 }
 0x278   : > { %12306 = vmatprep.mubr.msk.f32.mxu1 %vm13099_vm1, %v13100_v58  ;;  %12769 = vmatprep.subr.bf16.mxu1 %v13098_v9 }
 0x279   : > { %12348 = vmatprep.mubr.msk.f32.mxu0 %vm13099_vm1, %v13100_v58  ;;  %12787 = vmatprep.subr.bf16.mxu0 %v13098_v9  ;;  %v9463_v9 = vcombine.high %v13548_v47, %v13548_v47 }
 0x27b   : > { %v9493_v4 = vrot.slane %v9463_v9, %v13336_v1  ;;  %v14266_v9 = vsub.s32 %v13488_v7, %v13323_v56 }
 0x27d   : > { %v4350_v39 = vpop.f32.mrb[6].mxu1  ;;  %v4812_v41 = vpop.f32.mrb[8].mxu0 }
 0x27e   : > { %v14188_v12 = vmul.f32 %v9485_v48, %v4350_v39  ;;  %v14190_v63 = vmul.f32 %v9489_v21, %v4812_v41  ;;  %v11895_v16 = vpop.f32.mrb[7].mxu1  ;;  %v11937_v61 = vpop.f32.mrb[9].mxu0  ;;  %12307 = vmatmul.mubr.msk.f32.vlgmr.msra.gmra.mrb[16].mxu1 %vm2039_vm5, %v13788_v36  ;;  %12349 = vmatmul.mubr.msk.f32.vlgmr.msra.gmra.mrb[18].mxu0 %vm2039_vm5, %v13783_v34 }
 0x27f   : > { %12771 = vmatpush3.bf16.msra.mxu1 %v13651_v35  ;;  %12789 = vmatpush3.bf16.msra.mxu0 %v13651_v35  ;;  %v9465_v35 = vcombine.high %v13553_v60, %v13553_v60 }
 0x280   : > { %9745 = vrot.lane.b32.xlu0 %v14188_v12, %s13102_s28  ;;  %9747 = vrot.lane.b32.xlu1 %v14190_v63, %s13102_s28  ;;  %v9527_v30 = vsel %vm9514_vm13, %v14188_v12, 0.0  ;;  %v9530_v48 = vsel %vm9514_vm13, %v14190_v63, 0.0 }
 0x281   : > { %12313 = vmatprep.mubr.msk.f32.mxu1 %vm13099_vm1, %v13100_v58  ;;  %12355 = vmatprep.mubr.msk.f32.mxu0 %vm13099_vm1, %v13100_v58  ;;  %v9497_v5 = vrot.slane %v9465_v35, %v13336_v1 }
 0x282   : > { %12358 = vmatprep.subr.mxu1 %v13100_v58  ;;  %12388 = vmatprep.subr.mxu0 %v13100_v58 }
 0x286   : > { %12314 = vmatmul.mubr.msk.f32.vlgmr.msra.gmra.mrb[16].mxu1 %vm2039_vm5, %v13788_v36  ;;  %12356 = vmatmul.mubr.msk.f32.vlgmr.msra.gmra.mrb[18].mxu0 %vm2039_vm5, %v13783_v34  ;;  %vm9589_vm5 = vcmask 1046534  }
 0x287   : > { %12360 = vmatprep.mubr.msk.f32.mxu1 %vm13099_vm1, %v13100_v58  ;;  %12390 = vmatprep.mubr.msk.f32.mxu0 %vm13099_vm1, %v13100_v58 }
 0x29a   : > { %v9738_v47 = vpop.permute.xlu0 %9737  ;;  %v9740_v36 = vpop.permute.xlu1 %9739 }
 0x29b   : > { %v9761_v60 = vsel %vm9514_vm13, %v9738_v47, 0.0  ;;  %v9764_v59 = vsel %vm9514_vm13, %v9740_v36, 0.0 }
 0x2a9   : > { %v5274_v26 = vpop.f32.mrb[8].mxu1  ;;  %v5736_v27 = vpop.f32.mrb[10].mxu0 }
 0x2aa   : > { %v14222_v28 = vmul.f32 %v9493_v4, %v5274_v26  ;;  %v9513_v32 = vmul.f32 %v9497_v5, %v5736_v27  ;;  %v11979_v33 = vpop.f32.mrb[9].mxu1  ;;  %v12021_v34 = vpop.f32.mrb[11].mxu0 }
 0x2ac   : > { %9749 = vrot.lane.b32.xlu0 %v14222_v28, %s13102_s28  ;;  %9751 = vrot.lane.b32.xlu1 %v9513_v32, %s13102_s28  ;;  %v9536_v2 = vsel %vm9514_vm13, %v9513_v32, 0.0 }
 0x2c6   : > { %v9742_v42 = vpop.permute.xlu0 %9741  ;;  %v9744_v54 = vpop.permute.xlu1 %9743 }
 0x2c7   : > { %v9767_v44 = vsel %vm9514_vm13, %v9742_v42, 0.0  ;;  %v9770_v20 = vsel %vm9514_vm13, %v9744_v54, 0.0 }
 0x2cb   : > { %9762 = vadd.xlane.f32.xlu0 %v9761_v60 }
 0x2cf   : > { %9768 = vadd.xlane.f32.xlu0 %v9767_v44 }
 0x2d0   : > { %9765 = vadd.xlane.f32.xlu1 %v9764_v59  ;;  %v13033_v59 = vld [vmem:[%s13306_s18] sm:$0xff] }
 0x2d1   : > { %vm9415_vm7 = vcmp.eq.s32.totalorder %v13033_v59, 600 }
 0x2d3   : > { %9771 = vadd.xlane.f32.xlu0 %v9770_v20 }
 0x2d5   : > { %v14231_v15 = vpop.f32.mrb[10].mxu1  ;;  %v14233_v24 = vpop.f32.mrb[12].mxu0 }
 0x2d6   : > { %v12063_v38 = vpop.f32.mrb[11].mxu1  ;;  %v12105_v46 = vpop.f32.mrb[13].mxu0 }
 0x2f2   : > { %v9746_v52 = vpop.permute.xlu0 %9745  ;;  %v9748_v8 = vpop.permute.xlu1 %9747 }
 0x2f3   : > { %v9776_v10 = vsel %vm9514_vm13, %v9748_v8, 0.0  ;;  %v9773_v18 = vsel %vm9514_vm13, %v9746_v52, 0.0 }
 0x2f4   : > { %9777 = vadd.xlane.f32.xlu0 %v9776_v10  ;;  %9774 = vadd.xlane.f32.xlu1 %v9773_v18  ;;  %v9533_v10 = vsel %vm9514_vm13, %v14222_v28, 0.0 }
 0x301   : > { %v14237_v37 = vpop.f32.mrb[12].mxu1  ;;  %v14239_v22 = vpop.f32.mrb[14].mxu0 }
 0x302   : > { %v12147_v23 = vpop.f32.mrb[13].mxu1  ;;  %v12189_v50 = vpop.f32.mrb[15].mxu0 }
 0x31e   : > { %v9750_v55 = vpop.permute.xlu0 %9749  ;;  %v9752_v14 = vpop.permute.xlu1 %9751 }
 0x31f   : > { %v9779_v19 = vsel %vm9514_vm13, %v9750_v55, 0.0  ;;  %v9782_v17 = vsel %vm9514_vm13, %v9752_v14, 0.0 }
 0x320   : > { %9780 = vadd.xlane.f32.xlu1 %v9779_v19  ;;  %9783 = vadd.xlane.f32.xlu0 %v9782_v17 }
 0x324   : > { %9516 = vadd.xlane.f32.xlu1 %v9515_v43  ;;  %9519 = vadd.xlane.f32.xlu0 %v9518_v29 }
 0x328   : > { %9522 = vadd.xlane.f32.xlu1 %v9521_v53  ;;  %9525 = vadd.xlane.f32.xlu0 %v9524_v62 }
 0x32c   : > { %9528 = vadd.xlane.f32.xlu1 %v9527_v30 }
 0x32d   : > { %v14253_v57 = vpop.f32.mrb[14].mxu1  ;;  %v14255_v0 = vpop.f32.mrb[16].mxu0 }
 0x32e   : > { %v12231_v11 = vpop.f32.mrb[15].mxu1  ;;  %v12273_v13 = vpop.f32.mrb[17].mxu0 }
 0x330   : > { %9531 = vadd.xlane.f32.xlu1 %v9530_v48 }
 0x334   : > { %9537 = vadd.xlane.f32.xlu1 %v9536_v2 }
 0x358   : > { %v9763_v12 = vpop.xlane.xlu0 %9762 }
 0x359   : > { %v14260_v3 = vpop.f32.mrb[16].mxu1  ;;  %v14262_v21 = vpop.f32.mrb[18].mxu0  ;;  %v9796_v63 = vrot.slane %v9763_v12, %v14266_v9 }
 0x35a   : > { %v12315_v39 = vpop.f32.mrb[17].mxu1  ;;  %v12357_v41 = vpop.f32.mrb[19].mxu0 }
 0x35c   : > { %v9769_v16 = vpop.xlane.xlu0 %9768 }
 0x35d   : > { %v9766_v61 = vpop.xlane.xlu1 %9765  ;;  %v9804_v27 = vrot.slane %v9769_v16, %v14266_v9 }
 0x35e   : > { %v9800_v35 = vrot.slane %v9766_v61, %v14266_v9 }
 0x360   : > { %v9772_v4 = vpop.xlane.xlu0 %9771  ;;  %v9825_v5 = vsel %vm9579_vm14, %v9800_v35, %v9796_v63 }
 0x361   : > { %v9808_v32 = vrot.slane %v9772_v4, %v14266_v9  ;;  %v9826_v33 = vsel %vm9581_vm15, %v9804_v27, %v9825_v5 }
 0x363   : > { %v9827_v34 = vsel %vm9583_vm0, %v9808_v32, %v9826_v33 }
 0x381   : > { %v9775_v26 = vpop.xlane.xlu1 %9774  ;;  %v9778_v56 = vpop.xlane.xlu0 %9777 }
 0x382   : > { %v9812_v7 = vrot.slane %v9775_v26, %v14266_v9  ;;  %v9816_v47 = vrot.slane %v9778_v56, %v14266_v9 }
 0x384   : > { %v9828_v60 = vsel %vm9585_vm3, %v9812_v7, %v9827_v34 }
 0x385   : > { %v9829_v20 = vsel %vm9587_vm4, %v9816_v47, %v9828_v60 }
 0x3ad   : > { %v9784_v36 = vpop.xlane.xlu0 %9783  ;;  %v9781_v42 = vpop.xlane.xlu1 %9780 }
 0x3ae   : > { %v9824_v44 = vrot.slane %v9784_v36, %v14266_v9  ;;  %v9820_v54 = vrot.slane %v9781_v42, %v14266_v9 }
 0x3b0   : > { %v9830_v38 = vsel %vm9589_vm5, %v9820_v54, %v9829_v20 }
 0x3b1   : > { %v9831_v46 = vsel %vm9591_vm6, %v9824_v44, %v9830_v38  ;;  %v9517_v18 = vpop.xlane.xlu1 %9516  ;;  %v9520_v50 = vpop.xlane.xlu0 %9519 }
 0x3b2   : > { %v9833_v52 = vsel %vm9415_vm7, -1e+20, %v9831_v46  ;;  %v9554_v14 = vrot.slane %v9520_v50, %v14266_v9  ;;  %v9550_v19 = vrot.slane %v9517_v18, %v14266_v9 }
 0x3b3   : > { %v9834_v8 = vsel %vm9595_vm8, %v9833_v52, -inf }
 0x3b4   : > { %9835 = vmax.xlane.f32.xlu0 %v9834_v8  ;;  %v9580_v53 = vsel %vm9579_vm14, %v9554_v14, %v9550_v19 }
 0x3b5   : > { %v9523_v23 = vpop.xlane.xlu1 %9522  ;;  %v9526_v17 = vpop.xlane.xlu0 %9525 }
 0x3b6   : > { %v9558_v43 = vrot.slane %v9523_v23, %v14266_v9  ;;  %v9562_v62 = vrot.slane %v9526_v17, %v14266_v9 }
 0x3b8   : > { %9534 = vadd.xlane.f32.xlu0 %v9533_v10  ;;  %v9582_v28 = vsel %vm9581_vm15, %v9558_v43, %v9580_v53 }
 0x3b9   : > { %v9529_v55 = vpop.xlane.xlu1 %9528  ;;  %v9584_v41 = vsel %vm9583_vm0, %v9562_v62, %v9582_v28 }
 0x3ba   : > { %v9566_v11 = vrot.slane %v9529_v55, %v14266_v9 }
 0x3bc   : > { %v9586_v16 = vsel %vm9585_vm3, %v9566_v11, %v9584_v41 }
 0x3bd   : > { %v9532_v29 = vpop.xlane.xlu1 %9531 }
 0x3be   : > { %v9570_v48 = vrot.slane %v9532_v29, %v14266_v9 }
 0x3c0   : > { %v9588_v35 = vsel %vm9587_vm4, %v9570_v48, %v9586_v16 }
 0x3c1   : > { %v9538_v2 = vpop.xlane.xlu1 %9537 }
 0x3c2   : > { %v9578_v63 = vrot.slane %v9538_v2, %v14266_v9 }
 0x441   : > { %v9836_v30 = vpop.xlane.xlu0 %9835 }
 0x442   : > { %v9837_v13 = vsub.f32 %v9833_v52, %v9836_v30 }
 0x444   : > { %v9838_v39 = vmul.f32 1.442695, %v9837_v13 }
 0x445   : > { %v9535_v12 = vpop.xlane.xlu0 %9534 }
 0x446   : > { %13025 = vpow2.f32 %v9838_v39  ;;  %v9574_v61 = vrot.slane %v9535_v12, %v14266_v9 }
 0x448   : > { %v9590_v4 = vsel %vm9589_vm5, %v9574_v61, %v9588_v35 }
 0x449   : > { %v9592_v5 = vsel %vm9591_vm6, %v9578_v63, %v9590_v4 }
 0x44a   : > { %v9594_v26 = vsel %vm9415_vm7, -1e+20, %v9592_v5 }
 0x44b   : > { %v9596_v27 = vsel %vm9595_vm8, %v9594_v26, -inf }
 0x44c   : > { %9597 = vmax.xlane.f32.xlu0 %v9596_v27 }
 0x450   : > { %v13026_v32 = vpop.eup %13025 }
 0x451   : > { %v9840_v33 = vsel %vm9595_vm8, %v13026_v32, 0.0 }
 0x452   : > { %9841 = vadd.xlane.f32.xlu1 %v9840_v33 }
 0x4d9   : > { %v9598_v56 = vpop.xlane.xlu0 %9597 }
 0x4da   : > { %v9599_v7 = vsub.f32 %v9594_v26, %v9598_v56 }
 0x4dc   : > { %v9600_v34 = vmul.f32 1.442695, %v9599_v7 }
 0x4de   : > { %13027 = vpow2.f32 %v9600_v34 }
 0x4df   : > { %v9842_v47 = vpop.xlane.xlu1 %9841 }
 0x4e0   : > { %13029 = vrcp.f32 %v9842_v47 }
 0x4e8   : > { %v14306_v9 = vpop.eup %13027 }
 0x4e9   : > { %v9602_v60 = vsel %vm9595_vm8, %v14306_v9, 0.0 }
 0x4ea   : > { %v13030_v36 = vpop.eup %13029  ;;  %9603 = vadd.xlane.f32.xlu0 %v9602_v60 }
 0x4eb   : > { %v9844_v42 = vmul.f32 %v13030_v36, %v13026_v32 }
 0x4ed   : > { %10912 = vst.msk [vmem:[%s422_s12] sm:$0xff] %vm9595_vm8, %v9844_v42  ;;  %v9848_v44 = vrot.slane %v9844_v42, %v13336_v1  ;;  %v9862_v54 = vrot.slane %v9844_v42, %v13369_v31  ;;  %v9869_v59 = vrot.slane %v9844_v42, %v13377_v40  ;;  %v9883_v20 = vrot.slane %v9844_v42, %v13387_v49  ;;  %s394_s12 = scalar_lea.vmem [#allocation2], %s11057_s27  ;;  %s13038_s27 = sshll.u32 %s13104_s17, 4  ;;  %s13039_s27 = int_to_ptr.vmem [resolvable:$false] %s13038_s27 }
 0x4ee   : > { %v9897_v38 = vrot.slane %v9844_v42, %v13481_v51  ;;  %v9855_v46 = vrot.slane %v9844_v42, %v13348_v6  ;;  %v9876_v52 = vrot.slane %v9844_v42, %v13382_v45  ;;  %v9890_v8 = vrot.slane %v9844_v42, %v13478_v25  ;;  %s10931_s11 = sshll.u32 %s394_s12, 4  ;;  %s13040_s29 = scalar_lea.vmem %s13039_s27, 256  ;;  %s14469_s11 = int_to_ptr.vmem [resolvable:$true] %s10931_s11 }
 0x4ef   : > { %9850 = vbcast.lane.b32.xlu1 %v9848_v44, 256  ;;  %s13034_s28 = scalar_lea.vmem %s14469_s11, 128  ;;  %p13041_p0 = scmp.lt.s32.totalorder %s14469_s11, %s13039_s27 }
 0x4f0   : > { %p13035_p11 = scmp.ne.s32.totalorder %s14469_s11, %s13034_s28  ;;  %p13042_p1 = scmp.lt.s32.totalorder %s13040_s29, %s13034_s28 }
 0x4f2   : > { %p13036_p12 = pnand %p13035_p11, %p13198_p5  ;;  %p13043_p2 = por %p13042_p1, %p13041_p0 }
 0x4f3   : > { %9864 = vbcast.lane.b32.xlu1 %v9862_v54, 256 }
 0x4f4   : > { %p13037_p13 = pneg %p13036_p12 }
 0x4f6   : > { %p13044_p3 = pnand %p13043_p2, %p13037_p13 }
 0x4f7   : > { %9871 = vbcast.lane.b32.xlu1 %v9869_v59, 256 }
 0x4fb   : > { %9885 = vbcast.lane.b32.xlu1 %v9883_v20, 256 }
 0x4ff   : > { %9899 = vbcast.lane.b32.xlu1 %v9897_v38, 256 }
 0x500   : > { %9857 = vbcast.lane.b32.xlu0 %v9855_v46, 256 }
 0x504   : > { %9878 = vbcast.lane.b32.xlu0 %v9876_v52, 256 }
 0x508   : > { %9892 = vbcast.lane.b32.xlu0 %v9890_v8, 256 }
 0x561   : > { %v9851_v10 = vpop.permute.xlu1 %9850 }
 0x562   : > { %v9901_v50 = vmul.f32 %v9851_v10, %v14231_v15 }
 0x564   : > { %v9910_v17 = vsel %vm9909_vm9, %v9901_v50, 0.0 }
 0x565   : > { %v9865_v18 = vpop.permute.xlu1 %9864  ;;  %v9911_v53 = vrot.slane %v9910_v17, 4 }
 0x566   : > { %v9903_v14 = vmul.f32 %v9865_v18, %v14237_v37 }
 0x567   : > { %v9912_v39 = vadd.f32 %v9911_v53, %v9910_v17 }
 0x568   : > { %v9924_v43 = vsel %vm9909_vm9, %v9903_v14, 0.0 }
 0x569   : > { %v9872_v23 = vpop.permute.xlu1 %9871  ;;  %v9925_v28 = vrot.slane %v9924_v43, 4  ;;  %v9913_v63 = vrot.slane %v9912_v39, 2 }
 0x56a   : > { %v9904_v19 = vmul.f32 %v9872_v23, %v14239_v22 }
 0x56b   : > { %v9926_v41 = vadd.f32 %v9925_v28, %v9924_v43  ;;  %v9914_v34 = vadd.f32 %v9913_v63, %v9912_v39 }
 0x56c   : > { %v9931_v62 = vsel %vm9909_vm9, %v9904_v19, 0.0 }
 0x56d   : > { %v9886_v55 = vpop.permute.xlu1 %9885  ;;  %v9932_v11 = vrot.slane %v9931_v62, 4  ;;  %v9927_v5 = vrot.slane %v9926_v41, 2  ;;  %v9915_v10 = vrot.slane %v9914_v34, 1 }
 0x56e   : > { %v9906_v29 = vmul.f32 %v9886_v55, %v14255_v0 }
 0x56f   : > { %v9933_v16 = vadd.f32 %v9932_v11, %v9931_v62  ;;  %v9928_v42 = vadd.f32 %v9927_v5, %v9926_v41  ;;  %v9916_v28 = vadd.f32 %v9915_v10, %v9914_v34 }
 0x570   : > { %v9945_v13 = vsel %vm9909_vm9, %v9906_v29, 0.0 }
 0x571   : > { %v9900_v30 = vpop.permute.xlu1 %9899  ;;  %v9946_v12 = vrot.slane %v9945_v13, 4  ;;  %v9934_v33 = vrot.slane %v9933_v16, 2  ;;  %v9929_v19 = vrot.slane %v9928_v42, 1 }
 0x572   : > { %v9908_v48 = vmul.f32 %v9900_v30, %v14262_v21 }
 0x573   : > { %v9947_v26 = vadd.f32 %v9946_v12, %v9945_v13  ;;  %v9935_v20 = vadd.f32 %v9934_v33, %v9933_v16 }
 0x574   : > { %v9959_v61 = vsel %vm9909_vm9, %v9908_v48, 0.0 }
 0x575   : > { %v9960_v27 = vrot.slane %v9959_v61, 4  ;;  %v9948_v44 = vrot.slane %v9947_v26, 2  ;;  %v9936_v29 = vrot.slane %v9935_v20, 1 }
 0x577   : > { %v9604_v2 = vpop.xlane.xlu0 %9603  ;;  %v9961_v54 = vadd.f32 %v9960_v27, %v9959_v61  ;;  %v9949_v17 = vadd.f32 %v9948_v44, %v9947_v26  ;;  %v9937_v12 = vadd.f32 %v9936_v29, %v9935_v20 }
 0x578   : > { %13031 = vrcp.f32 %v9604_v2  ;;  %v9930_v2 = vadd.f32 %v9929_v19, %v9928_v42 }
 0x579   : > { %v9962_v43 = vrot.slane %v9961_v54, 2  ;;  %v9950_v39 = vrot.slane %v9949_v17, 1 }
 0x57b   : > { %v9858_v35 = vpop.permute.xlu0 %9857  ;;  %v9963_v41 = vadd.f32 %v9962_v43, %v9961_v54  ;;  %v9951_v27 = vadd.f32 %v9950_v39, %v9949_v17 }
 0x57c   : > { %v9902_v4 = vmul.f32 %v9858_v35, %v14233_v24 }
 0x57e   : > { %v9917_v32 = vsel %vm9909_vm9, %v9902_v4, 0.0 }
 0x57f   : > { %v9918_v56 = vrot.slane %v9917_v32, 4  ;;  %v9879_v7 = vpop.permute.xlu0 %9878 }
 0x580   : > { %v9905_v47 = vmul.f32 %v9879_v7, %v14253_v57 }
 0x581   : > { %v9919_v60 = vadd.f32 %v9918_v56, %v9917_v32  ;;  %v9964_v32 = vrot.slane %v9963_v41, 1 }
 0x582   : > { %v13032_v36 = vpop.eup %13031  ;;  %v9938_v59 = vsel %vm9909_vm9, %v9905_v47, 0.0 }
 0x583   : > { %v14338_v38 = vmul.f32 %v13032_v36, %v14306_v9  ;;  %v9920_v46 = vrot.slane %v9919_v60, 2  ;;  %v9939_v52 = vrot.slane %v9938_v59, 4  ;;  %v9893_v8 = vpop.permute.xlu0 %9892  ;;  %v9965_v36 = vadd.f32 %v9964_v32, %v9963_v41 }
 0x584   : > { %v9907_v18 = vmul.f32 %v9893_v8, %v14260_v3 }
 0x585   : > { %v9921_v23 = vadd.f32 %v9920_v46, %v9919_v60  ;;  %v9940_v50 = vadd.f32 %v9939_v52, %v9938_v59  ;;  %v9610_v55 = vrot.slane %v14338_v38, %v13336_v1  ;;  %v9617_v14 = vrot.slane %v14338_v38, %v13348_v6 }
 0x586   : > { %v9952_v9 = vsel %vm9909_vm9, %v9907_v18, 0.0  ;;  %v9631_v11 = vrot.slane %v14338_v38, %v13377_v40  ;;  %v9624_v6 = vrot.slane %v14338_v38, %v13369_v31  ;;  %v9638_v63 = vrot.slane %v14338_v38, %v13382_v45  ;;  %v9966_v31 = vld [vmem:[%s14517_s7 + $0x4] sm:$0xf] }
 0x587   : > { %v9922_v53 = vrot.slane %v9921_v23, 1  ;;  %v9941_v62 = vrot.slane %v9940_v50, 2  ;;  %v9953_v30 = vrot.slane %v9952_v9, 4  ;;  %9612 = vbcast.lane.b32.xlu0 %v9610_v55, 256  ;;  %9619 = vbcast.lane.b32.xlu1 %v9617_v14, 256  ;;  %v9989_v33 = vsel %vm9987_vm10, %v9966_v31, 0 }
 0x588   : > { %v14360_v45 = vand.u32 4294901760, %v9989_v33  ;;  %v9652_v60 = vrot.slane %v14338_v38, %v13478_v25  ;;  %v9645_v54 = vrot.slane %v14338_v38, %v13387_v49  ;;  %v9659_v59 = vrot.slane %v14338_v38, %v13481_v51  ;;  %v9728_v25 = vld [vmem:[%s14517_s7] sm:$0xf] }
 0x589   : > { %v9923_v13 = vadd.f32 %v9922_v53, %v9921_v23  ;;  %v9942_v1 = vadd.f32 %v9941_v62, %v9940_v50  ;;  %v9954_v48 = vadd.f32 %v9953_v30, %v9952_v9  ;;  %v14377_v20 = vsel %vm9987_vm10, %v9728_v25, 0 }
 0x58a   : > { %12359 = vmatpush3.msra.mxu1 %v14360_v45  ;;  %v14380_v46 = vand.u32 4294901760, %v14377_v20 }
 0x58b   : > { %v9975_v16 = vsel %vm9579_vm14, %v9923_v13, %v9916_v28  ;;  %v9943_v61 = vrot.slane %v9942_v1, 1  ;;  %v9955_v35 = vrot.slane %v9954_v48, 2  ;;  %9633 = vbcast.lane.b32.xlu0 %v9631_v11, 256  ;;  %9626 = vbcast.lane.b32.xlu1 %v9624_v6, 256 }
 0x58c   : > { %v9976_v40 = vsel %vm9581_vm15, %v9930_v2, %v9975_v16  ;;  %12363 = vmatprep.subr.mxu1 %v13100_v58  ;;  %12389 = vmatpush3.msra.mxu0 %v14380_v46 }
 0x58d   : > { %v9944_v4 = vadd.f32 %v9943_v61, %v9942_v1  ;;  %v9956_v5 = vadd.f32 %v9955_v35, %v9954_v48  ;;  %v9977_v26 = vsel %vm9583_vm0, %v9937_v12, %v9976_v40  ;;  %12398 = vmatprep.subr.mxu0 %v13100_v58 }
 0x58f   : > { %v9957_v56 = vrot.slane %v9956_v5, 1  ;;  %9640 = vbcast.lane.b32.xlu1 %v9638_v63, 256  ;;  %v9978_v7 = vsel %vm9585_vm3, %v9944_v4, %v9977_v26 }
 0x590   : > { %v9979_v34 = vsel %vm9587_vm4, %v9951_v27, %v9978_v7 }
 0x591   : > { %v9958_v47 = vadd.f32 %v9957_v56, %v9956_v5 }
 0x593   : > { %9654 = vbcast.lane.b32.xlu1 %v9652_v60, 256  ;;  %v9980_v42 = vsel %vm9589_vm5, %v9958_v47, %v9979_v34 }
 0x594   : > { %v9981_v44 = vsel %vm9591_vm6, %v9965_v36, %v9980_v42 }
 0x595   : > { %9982 = vrot.lane.b32.xlu0 %v9981_v44, %s13103_s20 }
 0x599   : > { %9647 = vbcast.lane.b32.xlu0 %v9645_v54, 256 }
 0x59d   : > { %9661 = vbcast.lane.b32.xlu0 %v9659_v59, 256 }
 0x5f9   : > { %v9613_v49 = vpop.permute.xlu0 %9612  ;;  %v9620_v52 = vpop.permute.xlu1 %9619 }
 0x5fa   : > { %v9663_v51 = vmul.f32 %v9613_v49, %v14231_v15  ;;  %v9664_v38 = vmul.f32 %v9620_v52, %v14233_v24 }
 0x5fc   : > { %v9672_v8 = vsel %vm9671_vm11, %v9663_v51, 0.0  ;;  %v9679_v10 = vsel %vm9671_vm11, %v9664_v38, 0.0 }
 0x5fd   : > { %v9673_v18 = vrot.slane %v9672_v8, 4  ;;  %v9680_v23 = vrot.slane %v9679_v10, 4  ;;  %v9634_v50 = vpop.permute.xlu0 %9633  ;;  %v9627_v55 = vpop.permute.xlu1 %9626 }
 0x5fe   : > { %v9666_v14 = vmul.f32 %v9634_v50, %v14239_v22  ;;  %v9665_v19 = vmul.f32 %v9627_v55, %v14237_v37  ;;  %v14395_v37 = vsub.f32 %v9989_v33, %v14360_v45 }
 0x5ff   : > { %v9674_v17 = vadd.f32 %v9673_v18, %v9672_v8  ;;  %v9681_v43 = vadd.f32 %v9680_v23, %v9679_v10 }
 0x600   : > { %v9693_v9 = vsel %vm9671_vm11, %v9666_v14, 0.0  ;;  %v9686_v15 = vsel %vm9671_vm11, %v9665_v19, 0.0  ;;  %v10070_v27 = vand.u32 4294901760, %v14395_v37 }
 0x601   : > { %v9675_v29 = vrot.slane %v9674_v17, 2  ;;  %v9682_v24 = vrot.slane %v9681_v43, 2  ;;  %v9694_v53 = vrot.slane %v9693_v9, 4  ;;  %v9687_v62 = vrot.slane %v9686_v15, 4  ;;  %v9641_v30 = vpop.permute.xlu1 %9640 }
 0x602   : > { %v9667_v28 = vmul.f32 %v9641_v30, %v14253_v57  ;;  %v10071_v52 = vsub.f32 %v14395_v37, %v10070_v27 }
 0x603   : > { %v9676_v11 = vadd.f32 %v9675_v29, %v9674_v17  ;;  %v9683_v13 = vadd.f32 %v9682_v24, %v9681_v43  ;;  %v9695_v1 = vadd.f32 %v9694_v53, %v9693_v9  ;;  %v9688_v48 = vadd.f32 %v9687_v62, %v9686_v15 }
 0x604   : > { %v9700_v22 = vsel %vm9671_vm11, %v9667_v28, 0.0  ;;  %v10072_v19 = vand.u32 4294901760, %v10071_v52 }
 0x605   : > { %v9677_v6 = vrot.slane %v9676_v11, 1  ;;  %v9684_v2 = vrot.slane %v9683_v13, 1  ;;  %v9696_v39 = vrot.slane %v9695_v1, 2  ;;  %v9689_v41 = vrot.slane %v9688_v48, 2  ;;  %v9655_v12 = vpop.permute.xlu1 %9654 }
 0x606   : > { %v9701_v16 = vrot.slane %v9700_v22, 4  ;;  %v9669_v61 = vmul.f32 %v9655_v12, %v14260_v3 }
 0x607   : > { %v9678_v35 = vadd.f32 %v9677_v6, %v9676_v11  ;;  %v9685_v57 = vadd.f32 %v9684_v2, %v9683_v13  ;;  %v9697_v63 = vadd.f32 %v9696_v39, %v9695_v1  ;;  %v9690_v40 = vadd.f32 %v9689_v41, %v9688_v48  ;;  %v9983_v4 = vpop.permute.xlu0 %9982 }
 0x608   : > { %v9702_v5 = vadd.f32 %v9701_v16, %v9700_v22  ;;  %v9714_v26 = vsel %vm9671_vm11, %v9669_v61, 0.0  ;;  %v9985_v31 = vsel %vm9984_vm12, %v9983_v4, 0  ;;  %v10535_v1 = vsub.f32 %v14377_v20, %v14380_v46 }
 0x609   : > { %v10445_v32 = vsel %vm9579_vm14, %v9685_v57, %v9678_v35  ;;  %v9698_v33 = vrot.slane %v9697_v63, 1  ;;  %v9691_v56 = vrot.slane %v9690_v40, 1  ;;  %v9715_v7 = vrot.slane %v9714_v26, 4 }
 0x60a   : > { %v9703_v34 = vrot.slane %v9702_v5, 2  ;;  %v14402_v47 = vand.u32 4294901760, %v9985_v31  ;;  %v10536_v41 = vand.u32 4294901760, %v10535_v1 }
 0x60b   : > { %v9699_v3 = vadd.f32 %v9698_v33, %v9697_v63  ;;  %v9692_v60 = vadd.f32 %v9691_v56, %v9690_v40  ;;  %v9716_v36 = vadd.f32 %v9715_v7, %v9714_v26  ;;  %v9648_v42 = vpop.permute.xlu0 %9647 }
 0x60c   : > { %v9704_v44 = vadd.f32 %v9703_v34, %v9702_v5  ;;  %v10058_v54 = vsub.f32 %v9985_v31, %v14402_v47  ;;  %v9668_v59 = vmul.f32 %v9648_v42, %v14255_v0  ;;  %v10537_v61 = vsub.f32 %v10535_v1, %v10536_v41 }
 0x60d   : > { %v10446_v25 = vsel %vm9581_vm15, %v9692_v60, %v10445_v32  ;;  %v9717_v49 = vrot.slane %v9716_v36, 2 }
 0x60e   : > { %v9705_v51 = vrot.slane %v9704_v44, 1  ;;  %v10447_v38 = vsel %vm9583_vm0, %v9699_v3, %v10446_v25  ;;  %v10059_v8 = vand.u32 4294901760, %v10058_v54  ;;  %v9707_v10 = vsel %vm9671_vm11, %v9668_v59, 0.0 }
 0x60f   : > { %v9708_v18 = vrot.slane %v9707_v10, 4  ;;  %v9662_v23 = vpop.permute.xlu0 %9661  ;;  %v9718_v43 = vadd.f32 %v9717_v49, %v9716_v36  ;;  %v10538_v57 = vand.u32 4294901760, %v10537_v61 }
 0x610   : > { %v9706_v50 = vadd.f32 %v9705_v51, %v9704_v44  ;;  %v10060_v55 = vsub.f32 %v10058_v54, %v10059_v8  ;;  %v9670_v14 = vmul.f32 %v9662_v23, %v14262_v21 }
 0x611   : > { %v9709_v0 = vadd.f32 %v9708_v18, %v9707_v10  ;;  %v9719_v30 = vrot.slane %v9718_v43, 1 }
 0x612   : > { %v10448_v17 = vsel %vm9585_vm3, %v9706_v50, %v10447_v38  ;;  %v10061_v9 = vand.u32 4294901760, %v10060_v55  ;;  %v9721_v15 = vsel %vm9671_vm11, %v9670_v14, 0.0 }
 0x613   : > { %v9710_v29 = vrot.slane %v9709_v0, 2  ;;  %v9722_v24 = vrot.slane %v9721_v15, 4  ;;  %v9720_v48 = vadd.f32 %v9719_v30, %v9718_v43 }
 0x614   : > { %12361 = vmatmul.mubr.f32.vlgmr.msra.gmra.mrb[18].mxu1 %v10061_v9 }
 0x615   : > { %v9711_v53 = vadd.f32 %v9710_v29, %v9709_v0  ;;  %v9723_v62 = vadd.f32 %v9722_v24, %v9721_v15  ;;  %12364 = vmatpush3.msra.mxu1 %v10072_v19  ;;  %12365 = vmatprep.mubr.msk.f32.mxu1 %vm13099_vm1, %v13100_v58  ;;  %v11121_v0 = vld [vmem:[%s14518_s8] ss:$0 sm:$0xff] }
 0x616   : > { %12368 = vmatprep.subr.mxu1 %v13100_v58 }
 0x617   : > { %v9712_v21 = vrot.slane %v9711_v53, 1  ;;  %v9724_v28 = vrot.slane %v9723_v62, 2 }
 0x618   : > { %12366 = vmatmul.mubr.f32.vlgmr.msra.gmra.mrb[20].mxu1 %v14402_v47 }
 0x619   : > { %v9713_v11 = vadd.f32 %v9712_v21, %v9711_v53  ;;  %v9725_v13 = vadd.f32 %v9724_v28, %v9723_v62  ;;  %12369 = vmatpush3.msra.mxu1 %v14395_v37  ;;  %12370 = vmatprep.mubr.msk.f32.mxu1 %vm13099_vm1, %v13100_v58 }
 0x61a   : > { %12373 = vmatprep.subr.mxu1 %v13100_v58 }
 0x61b   : > { %v10449_v22 = vsel %vm9587_vm4, %v9713_v11, %v10448_v17  ;;  %v9726_v6 = vrot.slane %v9725_v13, 1 }
 0x61c   : > { %v10450_v2 = vsel %vm9589_vm5, %v9720_v48, %v10449_v22  ;;  %12371 = vmatmul.mubr.f32.vlgmr.msra.gmra.mrb[22].mxu1 %v10058_v54 }
 0x61d   : > { %v9727_v39 = vadd.f32 %v9726_v6, %v9725_v13  ;;  %12374 = vmatpush3.msra.mxu1 %v14360_v45  ;;  %12375 = vmatprep.mubr.msk.f32.mxu1 %vm13099_vm1, %v13100_v58 }
 0x61e   : > { %12378 = vmatprep.subr.mxu1 %v13100_v58 }
 0x61f   : > { %v10451_v20 = vsel %vm9591_vm6, %v9727_v39, %v10450_v2 }
 0x620   : > { %v10452_v12 = vsel %vm9984_vm12, %v10451_v20, 0  ;;  %12376 = vmatmul.mubr.f32.vlgmr.msra.gmra.mrb[24].mxu1 %v10059_v8 }
 0x621   : > { %v10523_v16 = vand.u32 4294901760, %v10452_v12  ;;  %12379 = vmatpush3.msra.mxu1 %v10070_v27  ;;  %12380 = vmatprep.mubr.msk.f32.mxu1 %vm13099_vm1, %v13100_v58 }
 0x622   : > { %12383 = vmatprep.subr.mxu1 %v13100_v58 }
 0x623   : > { %v10524_v35 = vsub.f32 %v10452_v12, %v10523_v16 }
 0x624   : > { %12381 = vmatmul.mubr.f32.vlgmr.msra.gmra.mrb[26].mxu1 %v14402_v47 }
 0x625   : > { %12384 = vmatpush3.msra.mxu1 %v14360_v45  ;;  %12385 = vmatprep.mubr.msk.f32.mxu1 %vm13099_vm1, %v13100_v58  ;;  %v10525_v63 = vand.u32 4294901760, %v10524_v35 }
 0x626   : > { %12393 = vmatprep.subr.mxu1 %v13100_v58 }
 0x627   : > { %v10526_v37 = vsub.f32 %v10524_v35, %v10525_v63 }
 0x628   : > { %12386 = vmatmul.mubr.f32.vlgmr.msra.gmra.mrb[28].mxu1 %v14402_v47 }
 0x629   : > { %12394 = vmatpush3.msra.mxu1 %v10538_v57  ;;  %12395 = vmatprep.mubr.msk.f32.mxu1 %vm13099_vm1, %v13100_v58  ;;  %v10527_v40 = vand.u32 4294901760, %v10526_v37 }
 0x62a   : > { %12403 = vmatprep.subr.mxu1 %v13100_v58 }
 0x62b   : > { %12391 = vmatmul.mubr.f32.vlgmr.msra.gmra.mrb[20].mxu0 %v10527_v40 }
 0x62c   : > { %12396 = vmatmul.mubr.f32.vlgmr.msra.gmra.mrb[30].mxu1 %v10523_v16  ;;  %12399 = vmatpush3.msra.mxu0 %v10535_v1 }
 0x62d   : > { %12400 = vmatprep.mubr.msk.f32.mxu0 %vm13099_vm1, %v13100_v58  ;;  %12404 = vmatpush3.msra.mxu1 %v14380_v46 }
 0x62e   : > { %12405 = vmatprep.mubr.msk.f32.mxu1 %vm13099_vm1, %v13100_v58  ;;  %12408 = vmatprep.subr.mxu0 %v13100_v58 }
 0x62f   : > { %12401 = vmatmul.mubr.f32.vlgmr.msra.gmra.mrb[22].mxu0 %v10524_v35  ;;  %12413 = vmatprep.subr.mxu1 %v13100_v58 }
 0x630   : > { %12406 = vmatmul.mubr.f32.vlgmr.msra.gmra.mrb[32].mxu1 %v10525_v63  ;;  %12409 = vmatpush3.msra.mxu0 %v10536_v41 }
 0x631   : > { %12410 = vmatprep.mubr.msk.f32.mxu0 %vm13099_vm1, %v13100_v58  ;;  %12414 = vmatpush3.msra.mxu1 %v14380_v46 }
 0x632   : > { %12415 = vmatprep.mubr.msk.f32.mxu1 %vm13099_vm1, %v13100_v58 }
 0x633   : > { %12411 = vmatmul.mubr.f32.vlgmr.msra.gmra.mrb[24].mxu0 %v10523_v16 }
 0x634   : > { %12416 = vmatmul.mubr.f32.vlgmr.msra.gmra.mrb[34].mxu1 %v10523_v16 }
 0x6e7   : > { %v10063_v45 = vpop.f32.mrb[18].mxu1 }
 0x6e8   : > { %v12362_v4 = vpop.f32.mrb[19].mxu1 }
 0x6eb   : > { %v10139_v5 = vpop.f32.mrb[20].mxu1 }
 0x6ec   : > { %v10140_v26 = vadd.f32 %v10139_v5, %v10063_v45  ;;  %v12367_v31 = vpop.f32.mrb[21].mxu1 }
 0x6ef   : > { %v10213_v27 = vpop.f32.mrb[22].mxu1 }
 0x6f0   : > { %v10214_v32 = vadd.f32 %v10213_v27, %v10140_v26  ;;  %v12372_v33 = vpop.f32.mrb[23].mxu1 }
 0x6f3   : > { %v10287_v56 = vpop.f32.mrb[24].mxu1 }
 0x6f4   : > { %v10288_v7 = vadd.f32 %v10287_v56, %v10214_v32  ;;  %v12377_v34 = vpop.f32.mrb[25].mxu1 }
 0x6f7   : > { %v10361_v47 = vpop.f32.mrb[26].mxu1 }
 0x6f8   : > { %v10362_v3 = vadd.f32 %v10361_v47, %v10288_v7  ;;  %v12382_v46 = vpop.f32.mrb[27].mxu1 }
 0x6fb   : > { %v10433_v60 = vpop.f32.mrb[28].mxu1 }
 0x6fc   : > { %v10434_v36 = vadd.f32 %v10433_v60, %v10362_v3  ;;  %v12387_v58 = vpop.f32.mrb[29].mxu1 }
 0x6fe   : > { %v10529_v42 = vpop.f32.mrb[20].mxu0 }
 0x6ff   : > { %v10530_v44 = vadd.f32 %v10529_v42, %v10434_v36  ;;  %v10605_v54 = vpop.f32.mrb[30].mxu1  ;;  %v12392_v59 = vpop.f32.mrb[21].mxu0 }
 0x700   : > { %v12397_v25 = vpop.f32.mrb[31].mxu1 }
 0x701   : > { %v10606_v49 = vadd.f32 %v10605_v54, %v10530_v44 }
 0x702   : > { %v10679_v52 = vpop.f32.mrb[22].mxu0 }
 0x703   : > { %v10680_v51 = vadd.f32 %v10679_v52, %v10606_v49  ;;  %v10753_v38 = vpop.f32.mrb[32].mxu1  ;;  %v12402_v8 = vpop.f32.mrb[23].mxu0 }
 0x704   : > { %v12407_v10 = vpop.f32.mrb[33].mxu1 }
 0x705   : > { %v10754_v18 = vadd.f32 %v10753_v38, %v10680_v51 }
 0x706   : > { %v10827_v23 = vpop.f32.mrb[24].mxu0 }
 0x707   : > { %v10828_v50 = vadd.f32 %v10827_v23, %v10754_v18  ;;  %v10899_v55 = vpop.f32.mrb[34].mxu1  ;;  %v12412_v14 = vpop.f32.mrb[25].mxu0 }
 0x708   : > { %v12417_v19 = vpop.f32.mrb[35].mxu1 }
 0x709   : > { %v10900_v17 = vadd.f32 %v10899_v55, %v10828_v50 }
 0x70b   : > { %v10910_v43 = vadd.f32 %v11121_v0, %v10900_v17 }
 0x70d   : > { %10911 = vst.msk [vmem:[%s394_s12] sm:$0xff] %vm1461_vm2, %v10910_v43 }
 0x70e   : > { %13047 = shalt.err (!%p13044_p3)
}
 0x70f   : > { %s13048_s21 = scalar_lea.hbm %s14467_s25, 128  ;;  %s13052_s18 = scalar_lea.hbm %s14519_s9, 256 }
 0x710   : > { %p13049_p4 = scmp.ne.s32.totalorder %s14467_s25, %s13048_s21  ;;  %p13053_p9 = scmp.lt.u32.totalorder %s14467_s25, %s14519_s9 }
 0x711   : > { %p13054_p10 = scmp.lt.u32.totalorder %s13052_s18, %s13048_s21  ;;  %p13056_p12 = scmp.lt.u32.totalorder %s13048_s21, %s14467_s25 }
 0x712   : > { %p13050_p7 = pnand %p13049_p4, %p13198_p5 }
 0x713   : > { %p13055_p11 = por %p13054_p10, %p13053_p9 }
 0x714   : > { %p13051_p8 = pneg %p13050_p7 }
 0x715   : > { %p13057_p13 = por %p13056_p12, %p13055_p11 }
 0x717   : > { %p13058_p0 = pnand %p13057_p13, %p13051_p8 }
 0x719   : > { %13061 = shalt.err (!%p13058_p0)
}
 0x71a   : > { %12980 = dma.vmem_to_hbm [thread:$0]  (%p13198_p5), %s14469_s11, 128, %s14467_s25, %s10914_s26  }
 0x71b PF: > { %p12986_p1 = scmp.ge.s32.totalorder %s13096_s16, 2  ;;  %s10946_s28 = sand.u32 1, %s13084_s13  }
 0x71c   : > { %s10947_s27 = scalar_lea.sflag [#allocation3], %s10946_s28 }
 0x71d   : > { %p12983_p2 = pnand %p12986_p1, %p13202_p6 }
 0x71f   : > { %13079 = dma.done.wait (!%p12983_p2), %s10947_s27, 128  }
 0x720   : > { %13081 = vsyncadd (!%p12983_p2), %s10947_s27, 4294967168  ;;  %p21_p3 = scmp.ge.s32.totalorder %s13185_s19, 4   ;;  %s14523_s13 = smov %s13088_s14 }
 0x721   : > { %s14524_s14 = smov %s13092_s15  ;;  %s14525_s15 = smov %s13196_s22 }
 0x722   : > { %s14526_s16 = smov %s13185_s19  ;;  %23 = sbr.rel (!%p21_p3) target bundleno = 3 (0x3), region = 112 }
 0x729   :  { %10959 = vsyncpa [#allocation3], 1 }
 0x72a   :  { %10961 = vsyncpa [#allocation3 + $0x1], 1 }

</bundles_post_ra>
